<compile_context>
chip_gen: v7x
topology: tpu7x:2x2x1
jax: 0.10.0
libtpu: 0.0.40
codegen_flags: <defaults>
</compile_context>

<pallas_src>
import functools

import jax
import jax.numpy as jnp
from jax.experimental import pallas as pl
from jax.experimental.pallas import tpu as pltpu

B_BOXES = 2    # stand-in for config.B
C_CLASSES = 3  # stand-in for config.C

LANES = 128
SUBLANES = 8
N_PAR = 2              # leading "parallel" grid axis (both TCs on v7x)
MAX_TILE_CELLS = 8192  # cells per inner grid step (per feedback: 2048-8192)


def _make_yolo_loss_kernel(B: int, C: int, n_rows: int):
    """Kernel over channel-major slabs: block = (B*(5+C), n_rows, 128)."""
    D = 5 + C

    def kernel(p_ref, t_ref, o_ref, acc_main, acc_ce, acc_cnt):
        i = pl.program_id(1)

        # ---- init per-lane accumulators at the first inner step ----------
        @pl.when(i == 0)
        def _():
            acc_main[...] = jnp.zeros_like(acc_main)
            acc_ce[...] = jnp.zeros_like(acc_ce)
            acc_cnt[...] = jnp.zeros_like(acc_cnt)

        def pch(b, c):               # pred channel -> dense (n_rows, 128) slab
            return p_ref[b * D + c]

        def tch(b, c):               # target channel slab
            return t_ref[b * D + c]

        # ---- target corners / areas (shared across pred boxes) -----------
        t_xyxy, t_area = [], []
        for bt in range(B):
            x, y, w, h = tch(bt, 0), tch(bt, 1), tch(bt, 2), tch(bt, 3)
            hw, hh = w * 0.5, h * 0.5
            t_xyxy.append((x - hw, y - hh, x + hw, y + hh))
            t_area.append(w * h)

        zero = jnp.zeros((n_rows, LANES), jnp.float32)
        main_t, ce_t, cnt_t = zero, zero, zero

        for bp in range(B):
            px, py, pw, ph, pc = (pch(bp, k) for k in range(5))
            hw, hh = pw * 0.5, ph * 0.5
            ax1, ay1, ax2, ay2 = px - hw, py - hh, px + hw, py + hh
            area_p = pw * ph

            def iou_with(bt):
                bx1, by1, bx2, by2 = t_xyxy[bt]
                iw = jnp.maximum(jnp.minimum(ax2, bx2) - jnp.maximum(ax1, bx1), 0.0)
                ih = jnp.maximum(jnp.minimum(ay2, by2) - jnp.maximum(ay1, by1), 0.0)
                inter = iw * ih
                union = area_p + t_area[bt] - inter
                pos = union > 0.0
                # safe divide: never generates NaN even for 0/0
                return jnp.where(pos, inter / jnp.where(pos, union, 1.0), 0.0)

            # "gather" the responsible GT box with boolean masks only
            # (strict > keeps the first max -> matches torch/jnp argmax ties).
            gt = [tch(0, c) for c in range(D)]
            best = iou_with(0)
            for bt in range(1, B):
                iou_bt = iou_with(bt)
                m = iou_bt > best
                if bt + 1 < B:           # best not needed after the last box
                    best = jnp.where(m, iou_bt, best)
                gt = [jnp.where(m, tch(bt, c), g) for c, g in enumerate(gt)]

            gx, gy, gw, gh, gc = gt[0], gt[1], gt[2], gt[3], gt[4]
            obj = (gc > 0.0).astype(jnp.float32)

            # coordinate terms (sqrt(exp(x)) == exp(x/2))
            coord = (gx - px) ** 2 + (gy - py) ** 2
            coord += (jnp.exp(gw * 0.5) - jnp.exp(pw * 0.5)) ** 2
            coord += (jnp.exp(gh * 0.5) - jnp.exp(ph * 0.5)) ** 2

            # confidence: obj*d^2 + 0.5*(1-obj)*d^2 == (0.5 + 0.5*obj)*d^2
            d = gc - pc
            conf = (0.5 + 0.5 * obj) * (d * d)

            main_t = main_t + 5.0 * obj * coord + conf

            # masked cross-entropy (mean over responsible-object boxes)
            logits = [pch(bp, 5 + c) for c in range(C)]
            mmax = logits[0]
            for c in range(1, C):
                mmax = jnp.maximum(mmax, logits[c])
            ssum = jnp.exp(logits[0] - mmax)
            for c in range(1, C):
                ssum = ssum + jnp.exp(logits[c] - mmax)
            lse = mmax + jnp.log(ssum)

            tbest = gt[5]
            picked = logits[0]
            for c in range(1, C):
                m2 = gt[5 + c] > tbest
                tbest = jnp.where(m2, gt[5 + c], tbest)
                picked = jnp.where(m2, logits[c], picked)

            ce_t = ce_t + obj * (lse - picked)
            cnt_t = cnt_t + obj

        # ---- accumulate per-lane partials (no cross-lane reduce here) -----
        acc_main[...] += main_t
        acc_ce[...] += ce_t
        acc_cnt[...] += cnt_t

        # ---- finalize: 3 cross-lane reduces, lane-dense output block ------
        @pl.when(i == pl.num_programs(1) - 1)
        def _():
            main_s = jnp.sum(acc_main[...])
            ce_s = jnp.sum(acc_ce[...])
            cnt_s = jnp.sum(acc_cnt[...])
            sub = jax.lax.broadcasted_iota(jnp.int32, (SUBLANES, LANES), 0)
            lane = jax.lax.broadcasted_iota(jnp.int32, (SUBLANES, LANES), 1)
            vec = jnp.where((sub == 0) & (lane == 0), main_s,
                  jnp.where((sub == 0) & (lane == 1), ce_s,
                  jnp.where((sub == 0) & (lane == 2), cnt_s, 0.0)))
            o_ref[...] = vec[None, :, :]

    return kernel


@functools.partial(jax.jit, static_argnames=("B", "C"))
def yolo_loss_pallas(preds, targets, B=B_BOXES, C=C_CLASSES):
    """preds, targets: (N, S, S, B*(5+C)) — same convention as the torch module."""
    N, S, S2, BD = preds.shape
    D = 5 + C
    assert S == S2 and BD == B * D and preds.shape == targets.shape
    M = N * S * S

    # tile sizing: multiple of 8*128 cells, capped at MAX_TILE_CELLS
    per_core = -(-M // N_PAR)
    tile_cells = min(MAX_TILE_CELLS, ((per_core + 1023) // 1024) * 1024)
    n_rows = tile_cells // LANES
    n_inner = -(-per_core // tile_cells)
    m_pad = N_PAR * n_inner * tile_cells

    def to_layout(x):
        # (N,S,S,B*D) -> channel-major dense slabs (B*D, m_pad//128, 128) f32.
        # Padded cells are exactly zero (conf == 0 on both sides), so they
        # contribute nothing to any loss term nor to the CE count.
        # TODO(synk): fuse this relayout into the producer of preds/targets.
        x = jnp.transpose(x.reshape(M, BD)).astype(jnp.float32)
        x = jnp.pad(x, ((0, 0), (0, m_pad - M)))
        return x.reshape(BD, m_pad // LANES, LANES)

    p2 = to_layout(preds)
    t2 = to_layout(targets)

    in_spec = pl.BlockSpec((BD, n_rows, LANES),
                           lambda p, i: (0, p * n_inner + i, 0))

    out = pl.pallas_call(
        _make_yolo_loss_kernel(B, C, n_rows),
        out_shape=jax.ShapeDtypeStruct((N_PAR, SUBLANES, LANES), jnp.float32),
        grid_spec=pltpu.PrefetchScalarGridSpec(
            num_scalar_prefetch=0,
            grid=(N_PAR, n_inner),
            in_specs=[in_spec, in_spec],
            out_specs=pl.BlockSpec((1, SUBLANES, LANES), lambda p, i: (p, 0, 0)),
            scratch_shapes=[pltpu.VMEM((n_rows, LANES), jnp.float32)
                            for _ in range(3)],
        ),
        compiler_params=pltpu.CompilerParams(
            dimension_semantics=("parallel", "arbitrary"),
            vmem_limit_bytes=32 * 1024 * 1024,
        ),
    )(p2, t2)

    # combine the per-core partials (tiny, wrapper-side)
    main = jnp.sum(out[:, 0, 0])   # 5*coord + conf  (already summed)
    ce = jnp.sum(out[:, 0, 1])     # sum of masked cross-entropy
    cnt = jnp.sum(out[:, 0, 2])    # number of responsible-object boxes
    return (main + ce / cnt) / N


# ------------------------- pure-JAX reference ------------------------------
def yolo_loss_ref(preds, targets, B=B_BOXES, C=C_CLASSES):
    N, S = preds.shape[0], preds.shape[1]
    D = 5 + C
    p = preds.reshape(N, S, S, B, D).astype(jnp.float32)
    t = targets.reshape(N, S, S, B, D).astype(jnp.float32)

    a, b = p[..., :4], t[..., :4]
    area_a = (a[..., 2] * a[..., 3])[..., :, None]
    area_b = (b[..., 2] * b[..., 3])[..., None, :]

    def xyxy(box):
        x, y, w, h = box[..., 0], box[..., 1], box[..., 2], box[..., 3]
        return jnp.stack([x - w / 2, y - h / 2, x + w / 2, y + h / 2], -1)

    A = xyxy(a)[..., :, None, :]
    Bc = xyxy(b)[..., None, :, :]
    iw = jnp.clip(jnp.minimum(A[..., 2], Bc[..., 2]) - jnp.maximum(A[..., 0], Bc[..., 0]), 0)
    ih = jnp.clip(jnp.minimum(A[..., 3], Bc[..., 3]) - jnp.maximum(A[..., 1], Bc[..., 1]), 0)
    inter = iw * ih
    union = area_a + area_b - inter
    ious = jnp.where(union > 0, inter / union, 0.0)

    resp = jnp.argmax(ious, axis=-1)  # (N,S,S,B)
    gt = jnp.take_along_axis(t, jnp.broadcast_to(resp[..., None], t.shape), axis=3)

    obj = (gt[..., 4] > 0).astype(jnp.float32)
    loss = 5.0 * jnp.sum(obj * (gt[..., 0] - p[..., 0]) ** 2)
    loss += 5.0 * jnp.sum(obj * (gt[..., 1] - p[..., 1]) ** 2)
    loss += 5.0 * jnp.sum(obj * (jnp.exp(gt[..., 2] / 2) - jnp.exp(p[..., 2] / 2)) ** 2)
    loss += 5.0 * jnp.sum(obj * (jnp.exp(gt[..., 3] / 2) - jnp.exp(p[..., 3] / 2)) ** 2)
    d = gt[..., 4] - p[..., 4]
    loss += jnp.sum(obj * d * d) + 0.5 * jnp.sum((1 - obj) * d * d)

    logits = p[..., 5:]
    tcls = jnp.argmax(gt[..., 5:], axis=-1)
    lse = jax.nn.logsumexp(logits, axis=-1)
    picked = jnp.take_along_axis(logits, tcls[..., None], axis=-1)[..., 0]
    ce = lse - picked
    loss += jnp.sum(obj * ce) / jnp.sum(obj)
    return loss / N


if __name__ == "__main__":
    key = jax.random.PRNGKey(0)
    k1, k2 = jax.random.split(key)
    N, S = 2, 8
    shape = (N, S, S, B_BOXES * (5 + C_CLASSES))  # (2, 8, 8, 16)
    preds = jax.random.normal(k1, shape, dtype=jnp.float32)
    targets = jax.random.normal(k2, shape, dtype=jnp.float32)

    loss = yolo_loss_pallas(preds, targets)
    jax.block_until_ready(loss)

    ref = yolo_loss_ref(preds, targets)
    assert jnp.allclose(loss, ref, rtol=2e-3, atol=2e-3), (float(loss), float(ref))
    print("KERNEL_OK")
</pallas_src>

<mosaic_0001>
module attributes {stable_mosaic.version = 11 : i64} {
  func.func @kernel(%arg0: i32, %arg1: i32, %arg2: memref<16x8x128xf32, #tpu.memory_space<vmem>>, %arg3: memref<16x8x128xf32, #tpu.memory_space<vmem>>, %arg4: memref<1x8x128xf32, #tpu.memory_space<vmem>>, %arg5: memref<8x128xf32, #tpu.memory_space<vmem>>, %arg6: memref<8x128xf32, #tpu.memory_space<vmem>>, %arg7: memref<8x128xf32, #tpu.memory_space<vmem>>) attributes {dimension_semantics = [#tpu.dimension_semantics<parallel>, #tpu.dimension_semantics<arbitrary>], iteration_bounds = array<i64: 2, 1>, scalar_prefetch = 0 : i64, scratch_operands = 3 : i64, tpu.core_type = #tpu.core_type<tc>, window_params = [{transform_indices = @transform_0, window_bounds = array<i64: 16, 8, 128>}, {transform_indices = @transform_1, window_bounds = array<i64: 16, 8, 128>}, {transform_indices = @transform_2, window_bounds = array<i64: 1, 8, 128>}]} {
    %c0_i32 = arith.constant 0 : i32
    %0 = arith.cmpi eq, %arg1, %c0_i32 : i32
    %1 = arith.extui %0 : i1 to i32
    %c0_i32_0 = arith.constant 0 : i32
    %2 = arith.cmpi ne, %1, %c0_i32_0 : i32
    scf.if %2 {
      %cst_211 = arith.constant 0.000000e+00 : f32
      %382 = vector.broadcast %cst_211 : f32 to vector<8x128xf32>
      %c0_212 = arith.constant 0 : index
      %c0_213 = arith.constant 0 : index
      %383 = vector.load %arg5[%c0_212, %c0_213] : memref<8x128xf32, #tpu.memory_space<vmem>>, vector<8x128xf32>
      tpu.vector_store %arg5[%c0_212, %c0_213], %382 {strides = array<i32>} : memref<8x128xf32, #tpu.memory_space<vmem>>, vector<8x128xf32>,
      %cst_214 = arith.constant 0.000000e+00 : f32
      %384 = vector.broadcast %cst_214 : f32 to vector<8x128xf32>
      %c0_215 = arith.constant 0 : index
      %c0_216 = arith.constant 0 : index
      %385 = vector.load %arg6[%c0_215, %c0_216] : memref<8x128xf32, #tpu.memory_space<vmem>>, vector<8x128xf32>
      tpu.vector_store %arg6[%c0_215, %c0_216], %384 {strides = array<i32>} : memref<8x128xf32, #tpu.memory_space<vmem>>, vector<8x128xf32>,
      %cst_217 = arith.constant 0.000000e+00 : f32
      %386 = vector.broadcast %cst_217 : f32 to vector<8x128xf32>
      %c0_218 = arith.constant 0 : index
      %c0_219 = arith.constant 0 : index
      %387 = vector.load %arg7[%c0_218, %c0_219] : memref<8x128xf32, #tpu.memory_space<vmem>>, vector<8x128xf32>
      tpu.vector_store %arg7[%c0_218, %c0_219], %386 {strides = array<i32>} : memref<8x128xf32, #tpu.memory_space<vmem>>, vector<8x128xf32>,
    } else {
    }
    %c0 = arith.constant 0 : index
    %c0_1 = arith.constant 0 : index
    %c0_2 = arith.constant 0 : index
    %3 = vector.load %arg3[%c0, %c0_1, %c0_2] : memref<16x8x128xf32, #tpu.memory_space<vmem>>, vector<1x8x128xf32>
    %4 = vector.shape_cast %3 : vector<1x8x128xf32> to vector<8x128xf32>
    %c1 = arith.constant 1 : index
    %c0_3 = arith.constant 0 : index
    %c0_4 = arith.constant 0 : index
    %5 = vector.load %arg3[%c1, %c0_3, %c0_4] : memref<16x8x128xf32, #tpu.memory_space<vmem>>, vector<1x8x128xf32>
    %6 = vector.shape_cast %5 : vector<1x8x128xf32> to vector<8x128xf32>
    %c2 = arith.constant 2 : index
    %c0_5 = arith.constant 0 : index
    %c0_6 = arith.constant 0 : index
    %7 = vector.load %arg3[%c2, %c0_5, %c0_6] : memref<16x8x128xf32, #tpu.memory_space<vmem>>, vector<1x8x128xf32>
    %8 = vector.shape_cast %7 : vector<1x8x128xf32> to vector<8x128xf32>
    %c3 = arith.constant 3 : index
    %c0_7 = arith.constant 0 : index
    %c0_8 = arith.constant 0 : index
    %9 = vector.load %arg3[%c3, %c0_7, %c0_8] : memref<16x8x128xf32, #tpu.memory_space<vmem>>, vector<1x8x128xf32>
    %10 = vector.shape_cast %9 : vector<1x8x128xf32> to vector<8x128xf32>
    %cst = arith.constant 5.000000e-01 : f32
    %11 = vector.broadcast %cst : f32 to vector<8x128xf32>
    %12 = arith.mulf %8, %11 : vector<8x128xf32>
    %cst_9 = arith.constant 5.000000e-01 : f32
    %13 = vector.broadcast %cst_9 : f32 to vector<8x128xf32>
    %14 = arith.mulf %10, %13 : vector<8x128xf32>
    %15 = arith.subf %4, %12 : vector<8x128xf32>
    %16 = arith.subf %6, %14 : vector<8x128xf32>
    %17 = arith.addf %4, %12 : vector<8x128xf32>
    %18 = arith.addf %6, %14 : vector<8x128xf32>
    %19 = arith.mulf %8, %10 : vector<8x128xf32>
    %c8 = arith.constant 8 : index
    %c0_10 = arith.constant 0 : index
    %c0_11 = arith.constant 0 : index
    %20 = vector.load %arg3[%c8, %c0_10, %c0_11] : memref<16x8x128xf32, #tpu.memory_space<vmem>>, vector<1x8x128xf32>
    %21 = vector.shape_cast %20 : vector<1x8x128xf32> to vector<8x128xf32>
    %c9 = arith.constant 9 : index
    %c0_12 = arith.constant 0 : index
    %c0_13 = arith.constant 0 : index
    %22 = vector.load %arg3[%c9, %c0_12, %c0_13] : memref<16x8x128xf32, #tpu.memory_space<vmem>>, vector<1x8x128xf32>
    %23 = vector.shape_cast %22 : vector<1x8x128xf32> to vector<8x128xf32>
    %c10 = arith.constant 10 : index
    %c0_14 = arith.constant 0 : index
    %c0_15 = arith.constant 0 : index
    %24 = vector.load %arg3[%c10, %c0_14, %c0_15] : memref<16x8x128xf32, #tpu.memory_space<vmem>>, vector<1x8x128xf32>
    %25 = vector.shape_cast %24 : vector<1x8x128xf32> to vector<8x128xf32>
    %c11 = arith.constant 11 : index
    %c0_16 = arith.constant 0 : index
    %c0_17 = arith.constant 0 : index
    %26 = vector.load %arg3[%c11, %c0_16, %c0_17] : memref<16x8x128xf32, #tpu.memory_space<vmem>>, vector<1x8x128xf32>
    %27 = vector.shape_cast %26 : vector<1x8x128xf32> to vector<8x128xf32>
    %cst_18 = arith.constant 5.000000e-01 : f32
    %28 = vector.broadcast %cst_18 : f32 to vector<8x128xf32>
    %29 = arith.mulf %25, %28 : vector<8x128xf32>
    %cst_19 = arith.constant 5.000000e-01 : f32
    %30 = vector.broadcast %cst_19 : f32 to vector<8x128xf32>
    %31 = arith.mulf %27, %30 : vector<8x128xf32>
    %32 = arith.subf %21, %29 : vector<8x128xf32>
    %33 = arith.subf %23, %31 : vector<8x128xf32>
    %34 = arith.addf %21, %29 : vector<8x128xf32>
    %35 = arith.addf %23, %31 : vector<8x128xf32>
    %36 = arith.mulf %25, %27 : vector<8x128xf32>
    %cst_20 = arith.constant 0.000000e+00 : f32
    %37 = vector.broadcast %cst_20 : f32 to vector<8x128xf32>
    %c0_21 = arith.constant 0 : index
    %c0_22 = arith.constant 0 : index
    %c0_23 = arith.constant 0 : index
    %38 = vector.load %arg2[%c0_21, %c0_22, %c0_23] : memref<16x8x128xf32, #tpu.memory_space<vmem>>, vector<1x8x128xf32>
    %39 = vector.shape_cast %38 : vector<1x8x128xf32> to vector<8x128xf32>
    %c1_24 = arith.constant 1 : index
    %c0_25 = arith.constant 0 : index
    %c0_26 = arith.constant 0 : index
    %40 = vector.load %arg2[%c1_24, %c0_25, %c0_26] : memref<16x8x128xf32, #tpu.memory_space<vmem>>, vector<1x8x128xf32>
    %41 = vector.shape_cast %40 : vector<1x8x128xf32> to vector<8x128xf32>
    %c2_27 = arith.constant 2 : index
    %c0_28 = arith.constant 0 : index
    %c0_29 = arith.constant 0 : index
    %42 = vector.load %arg2[%c2_27, %c0_28, %c0_29] : memref<16x8x128xf32, #tpu.memory_space<vmem>>, vector<1x8x128xf32>
    %43 = vector.shape_cast %42 : vector<1x8x128xf32> to vector<8x128xf32>
    %c3_30 = arith.constant 3 : index
    %c0_31 = arith.constant 0 : index
    %c0_32 = arith.constant 0 : index
    %44 = vector.load %arg2[%c3_30, %c0_31, %c0_32] : memref<16x8x128xf32, #tpu.memory_space<vmem>>, vector<1x8x128xf32>
    %45 = vector.shape_cast %44 : vector<1x8x128xf32> to vector<8x128xf32>
    %c4 = arith.constant 4 : index
    %c0_33 = arith.constant 0 : index
    %c0_34 = arith.constant 0 : index
    %46 = vector.load %arg2[%c4, %c0_33, %c0_34] : memref<16x8x128xf32, #tpu.memory_space<vmem>>, vector<1x8x128xf32>
    %47 = vector.shape_cast %46 : vector<1x8x128xf32> to vector<8x128xf32>
    %cst_35 = arith.constant 5.000000e-01 : f32
    %48 = vector.broadcast %cst_35 : f32 to vector<8x128xf32>
    %49 = arith.mulf %43, %48 : vector<8x128xf32>
    %cst_36 = arith.constant 5.000000e-01 : f32
    %50 = vector.broadcast %cst_36 : f32 to vector<8x128xf32>
    %51 = arith.mulf %45, %50 : vector<8x128xf32>
    %52 = arith.subf %39, %49 : vector<8x128xf32>
    %53 = arith.subf %41, %51 : vector<8x128xf32>
    %54 = arith.addf %39, %49 : vector<8x128xf32>
    %55 = arith.addf %41, %51 : vector<8x128xf32>
    %56 = arith.mulf %43, %45 : vector<8x128xf32>
    %c0_37 = arith.constant 0 : index
    %c0_38 = arith.constant 0 : index
    %c0_39 = arith.constant 0 : index
    %57 = vector.load %arg3[%c0_37, %c0_38, %c0_39] : memref<16x8x128xf32, #tpu.memory_space<vmem>>, vector<1x8x128xf32>
    %58 = vector.shape_cast %57 : vector<1x8x128xf32> to vector<8x128xf32>
    %c1_40 = arith.constant 1 : index
    %c0_41 = arith.constant 0 : index
    %c0_42 = arith.constant 0 : index
    %59 = vector.load %arg3[%c1_40, %c0_41, %c0_42] : memref<16x8x128xf32, #tpu.memory_space<vmem>>, vector<1x8x128xf32>
    %60 = vector.shape_cast %59 : vector<1x8x128xf32> to vector<8x128xf32>
    %c2_43 = arith.constant 2 : index
    %c0_44 = arith.constant 0 : index
    %c0_45 = arith.constant 0 : index
    %61 = vector.load %arg3[%c2_43, %c0_44, %c0_45] : memref<16x8x128xf32, #tpu.memory_space<vmem>>, vector<1x8x128xf32>
    %62 = vector.shape_cast %61 : vector<1x8x128xf32> to vector<8x128xf32>
    %c3_46 = arith.constant 3 : index
    %c0_47 = arith.constant 0 : index
    %c0_48 = arith.constant 0 : index
    %63 = vector.load %arg3[%c3_46, %c0_47, %c0_48] : memref<16x8x128xf32, #tpu.memory_space<vmem>>, vector<1x8x128xf32>
    %64 = vector.shape_cast %63 : vector<1x8x128xf32> to vector<8x128xf32>
    %c4_49 = arith.constant 4 : index
    %c0_50 = arith.constant 0 : index
    %c0_51 = arith.constant 0 : index
    %65 = vector.load %arg3[%c4_49, %c0_50, %c0_51] : memref<16x8x128xf32, #tpu.memory_space<vmem>>, vector<1x8x128xf32>
    %66 = vector.shape_cast %65 : vector<1x8x128xf32> to vector<8x128xf32>
    %c5 = arith.constant 5 : index
    %c0_52 = arith.constant 0 : index
    %c0_53 = arith.constant 0 : index
    %67 = vector.load %arg3[%c5, %c0_52, %c0_53] : memref<16x8x128xf32, #tpu.memory_space<vmem>>, vector<1x8x128xf32>
    %68 = vector.shape_cast %67 : vector<1x8x128xf32> to vector<8x128xf32>
    %c6 = arith.constant 6 : index
    %c0_54 = arith.constant 0 : index
    %c0_55 = arith.constant 0 : index
    %69 = vector.load %arg3[%c6, %c0_54, %c0_55] : memref<16x8x128xf32, #tpu.memory_space<vmem>>, vector<1x8x128xf32>
    %70 = vector.shape_cast %69 : vector<1x8x128xf32> to vector<8x128xf32>
    %c7 = arith.constant 7 : index
    %c0_56 = arith.constant 0 : index
    %c0_57 = arith.constant 0 : index
    %71 = vector.load %arg3[%c7, %c0_56, %c0_57] : memref<16x8x128xf32, #tpu.memory_space<vmem>>, vector<1x8x128xf32>
    %72 = vector.shape_cast %71 : vector<1x8x128xf32> to vector<8x128xf32>
    %73 = arith.minimumf %54, %17 : vector<8x128xf32>
    %74 = arith.maximumf %52, %15 : vector<8x128xf32>
    %75 = arith.subf %73, %74 : vector<8x128xf32>
    %cst_58 = arith.constant 0.000000e+00 : f32
    %76 = vector.broadcast %cst_58 : f32 to vector<8x128xf32>
    %77 = arith.maximumf %75, %76 : vector<8x128xf32>
    %78 = arith.minimumf %55, %18 : vector<8x128xf32>
    %79 = arith.maximumf %53, %16 : vector<8x128xf32>
    %80 = arith.subf %78, %79 : vector<8x128xf32>
    %cst_59 = arith.constant 0.000000e+00 : f32
    %81 = vector.broadcast %cst_59 : f32 to vector<8x128xf32>
    %82 = arith.maximumf %80, %81 : vector<8x128xf32>
    %83 = arith.mulf %77, %82 : vector<8x128xf32>
    %84 = arith.addf %56, %19 : vector<8x128xf32>
    %85 = arith.subf %84, %83 : vector<8x128xf32>
    %cst_60 = arith.constant 0.000000e+00 : f32
    %86 = vector.broadcast %cst_60 : f32 to vector<8x128xf32>
    %87 = arith.cmpf ogt, %85, %86 : vector<8x128xf32>
    %cst_61 = arith.constant 1.000000e+00 : f32
    %88 = vector.broadcast %cst_61 : f32 to vector<8x128xf32>
    %89 = arith.select %87, %85, %88 : vector<8x128xi1>, vector<8x128xf32>
    %90 = arith.divf %83, %89 : vector<8x128xf32>
    %cst_62 = arith.constant 0.000000e+00 : f32
    %91 = vector.broadcast %cst_62 : f32 to vector<8x128xf32>
    %92 = arith.select %87, %90, %91 : vector<8x128xi1>, vector<8x128xf32>
    %93 = arith.minimumf %54, %34 : vector<8x128xf32>
    %94 = arith.maximumf %52, %32 : vector<8x128xf32>
    %95 = arith.subf %93, %94 : vector<8x128xf32>
    %cst_63 = arith.constant 0.000000e+00 : f32
    %96 = vector.broadcast %cst_63 : f32 to vector<8x128xf32>
    %97 = arith.maximumf %95, %96 : vector<8x128xf32>
    %98 = arith.minimumf %55, %35 : vector<8x128xf32>
    %99 = arith.maximumf %53, %33 : vector<8x128xf32>
    %100 = arith.subf %98, %99 : vector<8x128xf32>
    %cst_64 = arith.constant 0.000000e+00 : f32
    %101 = vector.broadcast %cst_64 : f32 to vector<8x128xf32>
    %102 = arith.maximumf %100, %101 : vector<8x128xf32>
    %103 = arith.mulf %97, %102 : vector<8x128xf32>
    %104 = arith.addf %56, %36 : vector<8x128xf32>
    %105 = arith.subf %104, %103 : vector<8x128xf32>
    %cst_65 = arith.constant 0.000000e+00 : f32
    %106 = vector.broadcast %cst_65 : f32 to vector<8x128xf32>
    %107 = arith.cmpf ogt, %105, %106 : vector<8x128xf32>
    %cst_66 = arith.constant 1.000000e+00 : f32
    %108 = vector.broadcast %cst_66 : f32 to vector<8x128xf32>
    %109 = arith.select %107, %105, %108 : vector<8x128xi1>, vector<8x128xf32>
    %110 = arith.divf %103, %109 : vector<8x128xf32>
    %cst_67 = arith.constant 0.000000e+00 : f32
    %111 = vector.broadcast %cst_67 : f32 to vector<8x128xf32>
    %112 = arith.select %107, %110, %111 : vector<8x128xi1>, vector<8x128xf32>
    %113 = arith.cmpf ogt, %112, %92 : vector<8x128xf32>
    %c8_68 = arith.constant 8 : index
    %c0_69 = arith.constant 0 : index
    %c0_70 = arith.constant 0 : index
    %114 = vector.load %arg3[%c8_68, %c0_69, %c0_70] : memref<16x8x128xf32, #tpu.memory_space<vmem>>, vector<1x8x128xf32>
    %115 = vector.shape_cast %114 : vector<1x8x128xf32> to vector<8x128xf32>
    %116 = arith.select %113, %115, %58 : vector<8x128xi1>, vector<8x128xf32>
    %c9_71 = arith.constant 9 : index
    %c0_72 = arith.constant 0 : index
    %c0_73 = arith.constant 0 : index
    %117 = vector.load %arg3[%c9_71, %c0_72, %c0_73] : memref<16x8x128xf32, #tpu.memory_space<vmem>>, vector<1x8x128xf32>
    %118 = vector.shape_cast %117 : vector<1x8x128xf32> to vector<8x128xf32>
    %119 = arith.select %113, %118, %60 : vector<8x128xi1>, vector<8x128xf32>
    %c10_74 = arith.constant 10 : index
    %c0_75 = arith.constant 0 : index
    %c0_76 = arith.constant 0 : index
    %120 = vector.load %arg3[%c10_74, %c0_75, %c0_76] : memref<16x8x128xf32, #tpu.memory_space<vmem>>, vector<1x8x128xf32>
    %121 = vector.shape_cast %120 : vector<1x8x128xf32> to vector<8x128xf32>
    %122 = arith.select %113, %121, %62 : vector<8x128xi1>, vector<8x128xf32>
    %c11_77 = arith.constant 11 : index
    %c0_78 = arith.constant 0 : index
    %c0_79 = arith.constant 0 : index
    %123 = vector.load %arg3[%c11_77, %c0_78, %c0_79] : memref<16x8x128xf32, #tpu.memory_space<vmem>>, vector<1x8x128xf32>
    %124 = vector.shape_cast %123 : vector<1x8x128xf32> to vector<8x128xf32>
    %125 = arith.select %113, %124, %64 : vector<8x128xi1>, vector<8x128xf32>
    %c12 = arith.constant 12 : index
    %c0_80 = arith.constant 0 : index
    %c0_81 = arith.constant 0 : index
    %126 = vector.load %arg3[%c12, %c0_80, %c0_81] : memref<16x8x128xf32, #tpu.memory_space<vmem>>, vector<1x8x128xf32>
    %127 = vector.shape_cast %126 : vector<1x8x128xf32> to vector<8x128xf32>
    %128 = arith.select %113, %127, %66 : vector<8x128xi1>, vector<8x128xf32>
    %c13 = arith.constant 13 : index
    %c0_82 = arith.constant 0 : index
    %c0_83 = arith.constant 0 : index
    %129 = vector.load %arg3[%c13, %c0_82, %c0_83] : memref<16x8x128xf32, #tpu.memory_space<vmem>>, vector<1x8x128xf32>
    %130 = vector.shape_cast %129 : vector<1x8x128xf32> to vector<8x128xf32>
    %131 = arith.select %113, %130, %68 : vector<8x128xi1>, vector<8x128xf32>
    %c14 = arith.constant 14 : index
    %c0_84 = arith.constant 0 : index
    %c0_85 = arith.constant 0 : index
    %132 = vector.load %arg3[%c14, %c0_84, %c0_85] : memref<16x8x128xf32, #tpu.memory_space<vmem>>, vector<1x8x128xf32>
    %133 = vector.shape_cast %132 : vector<1x8x128xf32> to vector<8x128xf32>
    %134 = arith.select %113, %133, %70 : vector<8x128xi1>, vector<8x128xf32>
    %c15 = arith.constant 15 : index
    %c0_86 = arith.constant 0 : index
    %c0_87 = arith.constant 0 : index
    %135 = vector.load %arg3[%c15, %c0_86, %c0_87] : memref<16x8x128xf32, #tpu.memory_space<vmem>>, vector<1x8x128xf32>
    %136 = vector.shape_cast %135 : vector<1x8x128xf32> to vector<8x128xf32>
    %137 = arith.select %113, %136, %72 : vector<8x128xi1>, vector<8x128xf32>
    %cst_88 = arith.constant 0.000000e+00 : f32
    %138 = vector.broadcast %cst_88 : f32 to vector<8x128xf32>
    %139 = arith.cmpf ogt, %128, %138 : vector<8x128xf32>
    %140 = arith.extui %139 : vector<8x128xi1> to vector<8x128xi32>
    %141 = arith.sitofp %140 : vector<8x128xi32> to vector<8x128xf32>
    %142 = arith.subf %116, %39 : vector<8x128xf32>
    %143 = arith.mulf %142, %142 : vector<8x128xf32>
    %144 = arith.subf %119, %41 : vector<8x128xf32>
    %145 = arith.mulf %144, %144 : vector<8x128xf32>
    %146 = arith.addf %143, %145 : vector<8x128xf32>
    %cst_89 = arith.constant 5.000000e-01 : f32
    %147 = vector.broadcast %cst_89 : f32 to vector<8x128xf32>
    %148 = arith.mulf %122, %147 : vector<8x128xf32>
    %149 = math.exp %148 : vector<8x128xf32>
    %cst_90 = arith.constant 5.000000e-01 : f32
    %150 = vector.broadcast %cst_90 : f32 to vector<8x128xf32>
    %151 = arith.mulf %43, %150 : vector<8x128xf32>
    %152 = math.exp %151 : vector<8x128xf32>
    %153 = arith.subf %149, %152 : vector<8x128xf32>
    %154 = arith.mulf %153, %153 : vector<8x128xf32>
    %155 = arith.addf %146, %154 : vector<8x128xf32>
    %cst_91 = arith.constant 5.000000e-01 : f32
    %156 = vector.broadcast %cst_91 : f32 to vector<8x128xf32>
    %157 = arith.mulf %125, %156 : vector<8x128xf32>
    %158 = math.exp %157 : vector<8x128xf32>
    %cst_92 = arith.constant 5.000000e-01 : f32
    %159 = vector.broadcast %cst_92 : f32 to vector<8x128xf32>
    %160 = arith.mulf %45, %159 : vector<8x128xf32>
    %161 = math.exp %160 : vector<8x128xf32>
    %162 = arith.subf %158, %161 : vector<8x128xf32>
    %163 = arith.mulf %162, %162 : vector<8x128xf32>
    %164 = arith.addf %155, %163 : vector<8x128xf32>
    %165 = arith.subf %128, %47 : vector<8x128xf32>
    %cst_93 = arith.constant 5.000000e-01 : f32
    %166 = vector.broadcast %cst_93 : f32 to vector<8x128xf32>
    %167 = arith.mulf %166, %141 : vector<8x128xf32>
    %cst_94 = arith.constant 5.000000e-01 : f32
    %168 = vector.broadcast %cst_94 : f32 to vector<8x128xf32>
    %169 = arith.addf %168, %167 : vector<8x128xf32>
    %170 = arith.mulf %165, %165 : vector<8x128xf32>
    %171 = arith.mulf %169, %170 : vector<8x128xf32>
    %cst_95 = arith.constant 5.000000e+00 : f32
    %172 = vector.broadcast %cst_95 : f32 to vector<8x128xf32>
    %173 = arith.mulf %172, %141 : vector<8x128xf32>
    %174 = arith.mulf %173, %164 : vector<8x128xf32>
    %175 = arith.addf %37, %174 : vector<8x128xf32>
    %176 = arith.addf %175, %171 : vector<8x128xf32>
    %c5_96 = arith.constant 5 : index
    %c0_97 = arith.constant 0 : index
    %c0_98 = arith.constant 0 : index
    %177 = vector.load %arg2[%c5_96, %c0_97, %c0_98] : memref<16x8x128xf32, #tpu.memory_space<vmem>>, vector<1x8x128xf32>
    %178 = vector.shape_cast %177 : vector<1x8x128xf32> to vector<8x128xf32>
    %c6_99 = arith.constant 6 : index
    %c0_100 = arith.constant 0 : index
    %c0_101 = arith.constant 0 : index
    %179 = vector.load %arg2[%c6_99, %c0_100, %c0_101] : memref<16x8x128xf32, #tpu.memory_space<vmem>>, vector<1x8x128xf32>
    %180 = vector.shape_cast %179 : vector<1x8x128xf32> to vector<8x128xf32>
    %c7_102 = arith.constant 7 : index
    %c0_103 = arith.constant 0 : index
    %c0_104 = arith.constant 0 : index
    %181 = vector.load %arg2[%c7_102, %c0_103, %c0_104] : memref<16x8x128xf32, #tpu.memory_space<vmem>>, vector<1x8x128xf32>
    %182 = vector.shape_cast %181 : vector<1x8x128xf32> to vector<8x128xf32>
    %183 = arith.maximumf %178, %180 : vector<8x128xf32>
    %184 = arith.maximumf %183, %182 : vector<8x128xf32>
    %185 = arith.subf %178, %184 : vector<8x128xf32>
    %186 = math.exp %185 : vector<8x128xf32>
    %187 = arith.subf %180, %184 : vector<8x128xf32>
    %188 = math.exp %187 : vector<8x128xf32>
    %189 = arith.addf %186, %188 : vector<8x128xf32>
    %190 = arith.subf %182, %184 : vector<8x128xf32>
    %191 = math.exp %190 : vector<8x128xf32>
    %192 = arith.addf %189, %191 : vector<8x128xf32>
    %193 = math.log %192 : vector<8x128xf32>
    %194 = arith.addf %184, %193 : vector<8x128xf32>
    %195 = arith.cmpf ogt, %134, %131 : vector<8x128xf32>
    %196 = arith.select %195, %134, %131 : vector<8x128xi1>, vector<8x128xf32>
    %197 = arith.select %195, %180, %178 : vector<8x128xi1>, vector<8x128xf32>
    %198 = arith.cmpf ogt, %137, %196 : vector<8x128xf32>
    %199 = arith.select %198, %182, %197 : vector<8x128xi1>, vector<8x128xf32>
    %200 = arith.subf %194, %199 : vector<8x128xf32>
    %201 = arith.mulf %141, %200 : vector<8x128xf32>
    %202 = arith.addf %37, %201 : vector<8x128xf32>
    %203 = arith.addf %37, %141 : vector<8x128xf32>
    %c8_105 = arith.constant 8 : index
    %c0_106 = arith.constant 0 : index
    %c0_107 = arith.constant 0 : index
    %204 = vector.load %arg2[%c8_105, %c0_106, %c0_107] : memref<16x8x128xf32, #tpu.memory_space<vmem>>, vector<1x8x128xf32>
    %205 = vector.shape_cast %204 : vector<1x8x128xf32> to vector<8x128xf32>
    %c9_108 = arith.constant 9 : index
    %c0_109 = arith.constant 0 : index
    %c0_110 = arith.constant 0 : index
    %206 = vector.load %arg2[%c9_108, %c0_109, %c0_110] : memref<16x8x128xf32, #tpu.memory_space<vmem>>, vector<1x8x128xf32>
    %207 = vector.shape_cast %206 : vector<1x8x128xf32> to vector<8x128xf32>
    %c10_111 = arith.constant 10 : index
    %c0_112 = arith.constant 0 : index
    %c0_113 = arith.constant 0 : index
    %208 = vector.load %arg2[%c10_111, %c0_112, %c0_113] : memref<16x8x128xf32, #tpu.memory_space<vmem>>, vector<1x8x128xf32>
    %209 = vector.shape_cast %208 : vector<1x8x128xf32> to vector<8x128xf32>
    %c11_114 = arith.constant 11 : index
    %c0_115 = arith.constant 0 : index
    %c0_116 = arith.constant 0 : index
    %210 = vector.load %arg2[%c11_114, %c0_115, %c0_116] : memref<16x8x128xf32, #tpu.memory_space<vmem>>, vector<1x8x128xf32>
    %211 = vector.shape_cast %210 : vector<1x8x128xf32> to vector<8x128xf32>
    %c12_117 = arith.constant 12 : index
    %c0_118 = arith.constant 0 : index
    %c0_119 = arith.constant 0 : index
    %212 = vector.load %arg2[%c12_117, %c0_118, %c0_119] : memref<16x8x128xf32, #tpu.memory_space<vmem>>, vector<1x8x128xf32>
    %213 = vector.shape_cast %212 : vector<1x8x128xf32> to vector<8x128xf32>
    %cst_120 = arith.constant 5.000000e-01 : f32
    %214 = vector.broadcast %cst_120 : f32 to vector<8x128xf32>
    %215 = arith.mulf %209, %214 : vector<8x128xf32>
    %cst_121 = arith.constant 5.000000e-01 : f32
    %216 = vector.broadcast %cst_121 : f32 to vector<8x128xf32>
    %217 = arith.mulf %211, %216 : vector<8x128xf32>
    %218 = arith.subf %205, %215 : vector<8x128xf32>
    %219 = arith.subf %207, %217 : vector<8x128xf32>
    %220 = arith.addf %205, %215 : vector<8x128xf32>
    %221 = arith.addf %207, %217 : vector<8x128xf32>
    %222 = arith.mulf %209, %211 : vector<8x128xf32>
    %c0_122 = arith.constant 0 : index
    %c0_123 = arith.constant 0 : index
    %c0_124 = arith.constant 0 : index
    %223 = vector.load %arg3[%c0_122, %c0_123, %c0_124] : memref<16x8x128xf32, #tpu.memory_space<vmem>>, vector<1x8x128xf32>
    %224 = vector.shape_cast %223 : vector<1x8x128xf32> to vector<8x128xf32>
    %c1_125 = arith.constant 1 : index
    %c0_126 = arith.constant 0 : index
    %c0_127 = arith.constant 0 : index
    %225 = vector.load %arg3[%c1_125, %c0_126, %c0_127] : memref<16x8x128xf32, #tpu.memory_space<vmem>>, vector<1x8x128xf32>
    %226 = vector.shape_cast %225 : vector<1x8x128xf32> to vector<8x128xf32>
    %c2_128 = arith.constant 2 : index
    %c0_129 = arith.constant 0 : index
    %c0_130 = arith.constant 0 : index
    %227 = vector.load %arg3[%c2_128, %c0_129, %c0_130] : memref<16x8x128xf32, #tpu.memory_space<vmem>>, vector<1x8x128xf32>
    %228 = vector.shape_cast %227 : vector<1x8x128xf32> to vector<8x128xf32>
    %c3_131 = arith.constant 3 : index
    %c0_132 = arith.constant 0 : index
    %c0_133 = arith.constant 0 : index
    %229 = vector.load %arg3[%c3_131, %c0_132, %c0_133] : memref<16x8x128xf32, #tpu.memory_space<vmem>>, vector<1x8x128xf32>
    %230 = vector.shape_cast %229 : vector<1x8x128xf32> to vector<8x128xf32>
    %c4_134 = arith.constant 4 : index
    %c0_135 = arith.constant 0 : index
    %c0_136 = arith.constant 0 : index
    %231 = vector.load %arg3[%c4_134, %c0_135, %c0_136] : memref<16x8x128xf32, #tpu.memory_space<vmem>>, vector<1x8x128xf32>
    %232 = vector.shape_cast %231 : vector<1x8x128xf32> to vector<8x128xf32>
    %c5_137 = arith.constant 5 : index
    %c0_138 = arith.constant 0 : index
    %c0_139 = arith.constant 0 : index
    %233 = vector.load %arg3[%c5_137, %c0_138, %c0_139] : memref<16x8x128xf32, #tpu.memory_space<vmem>>, vector<1x8x128xf32>
    %234 = vector.shape_cast %233 : vector<1x8x128xf32> to vector<8x128xf32>
    %c6_140 = arith.constant 6 : index
    %c0_141 = arith.constant 0 : index
    %c0_142 = arith.constant 0 : index
    %235 = vector.load %arg3[%c6_140, %c0_141, %c0_142] : memref<16x8x128xf32, #tpu.memory_space<vmem>>, vector<1x8x128xf32>
    %236 = vector.shape_cast %235 : vector<1x8x128xf32> to vector<8x128xf32>
    %c7_143 = arith.constant 7 : index
    %c0_144 = arith.constant 0 : index
    %c0_145 = arith.constant 0 : index
    %237 = vector.load %arg3[%c7_143, %c0_144, %c0_145] : memref<16x8x128xf32, #tpu.memory_space<vmem>>, vector<1x8x128xf32>
    %238 = vector.shape_cast %237 : vector<1x8x128xf32> to vector<8x128xf32>
    %239 = arith.minimumf %220, %17 : vector<8x128xf32>
    %240 = arith.maximumf %218, %15 : vector<8x128xf32>
    %241 = arith.subf %239, %240 : vector<8x128xf32>
    %cst_146 = arith.constant 0.000000e+00 : f32
    %242 = vector.broadcast %cst_146 : f32 to vector<8x128xf32>
    %243 = arith.maximumf %241, %242 : vector<8x128xf32>
    %244 = arith.minimumf %221, %18 : vector<8x128xf32>
    %245 = arith.maximumf %219, %16 : vector<8x128xf32>
    %246 = arith.subf %244, %245 : vector<8x128xf32>
    %cst_147 = arith.constant 0.000000e+00 : f32
    %247 = vector.broadcast %cst_147 : f32 to vector<8x128xf32>
    %248 = arith.maximumf %246, %247 : vector<8x128xf32>
    %249 = arith.mulf %243, %248 : vector<8x128xf32>
    %250 = arith.addf %222, %19 : vector<8x128xf32>
    %251 = arith.subf %250, %249 : vector<8x128xf32>
    %cst_148 = arith.constant 0.000000e+00 : f32
    %252 = vector.broadcast %cst_148 : f32 to vector<8x128xf32>
    %253 = arith.cmpf ogt, %251, %252 : vector<8x128xf32>
    %cst_149 = arith.constant 1.000000e+00 : f32
    %254 = vector.broadcast %cst_149 : f32 to vector<8x128xf32>
    %255 = arith.select %253, %251, %254 : vector<8x128xi1>, vector<8x128xf32>
    %256 = arith.divf %249, %255 : vector<8x128xf32>
    %cst_150 = arith.constant 0.000000e+00 : f32
    %257 = vector.broadcast %cst_150 : f32 to vector<8x128xf32>
    %258 = arith.select %253, %256, %257 : vector<8x128xi1>, vector<8x128xf32>
    %259 = arith.minimumf %220, %34 : vector<8x128xf32>
    %260 = arith.maximumf %218, %32 : vector<8x128xf32>
    %261 = arith.subf %259, %260 : vector<8x128xf32>
    %cst_151 = arith.constant 0.000000e+00 : f32
    %262 = vector.broadcast %cst_151 : f32 to vector<8x128xf32>
    %263 = arith.maximumf %261, %262 : vector<8x128xf32>
    %264 = arith.minimumf %221, %35 : vector<8x128xf32>
    %265 = arith.maximumf %219, %33 : vector<8x128xf32>
    %266 = arith.subf %264, %265 : vector<8x128xf32>
    %cst_152 = arith.constant 0.000000e+00 : f32
    %267 = vector.broadcast %cst_152 : f32 to vector<8x128xf32>
    %268 = arith.maximumf %266, %267 : vector<8x128xf32>
    %269 = arith.mulf %263, %268 : vector<8x128xf32>
    %270 = arith.addf %222, %36 : vector<8x128xf32>
    %271 = arith.subf %270, %269 : vector<8x128xf32>
    %cst_153 = arith.constant 0.000000e+00 : f32
    %272 = vector.broadcast %cst_153 : f32 to vector<8x128xf32>
    %273 = arith.cmpf ogt, %271, %272 : vector<8x128xf32>
    %cst_154 = arith.constant 1.000000e+00 : f32
    %274 = vector.broadcast %cst_154 : f32 to vector<8x128xf32>
    %275 = arith.select %273, %271, %274 : vector<8x128xi1>, vector<8x128xf32>
    %276 = arith.divf %269, %275 : vector<8x128xf32>
    %cst_155 = arith.constant 0.000000e+00 : f32
    %277 = vector.broadcast %cst_155 : f32 to vector<8x128xf32>
    %278 = arith.select %273, %276, %277 : vector<8x128xi1>, vector<8x128xf32>
    %279 = arith.cmpf ogt, %278, %258 : vector<8x128xf32>
    %c8_156 = arith.constant 8 : index
    %c0_157 = arith.constant 0 : index
    %c0_158 = arith.constant 0 : index
    %280 = vector.load %arg3[%c8_156, %c0_157, %c0_158] : memref<16x8x128xf32, #tpu.memory_space<vmem>>, vector<1x8x128xf32>
    %281 = vector.shape_cast %280 : vector<1x8x128xf32> to vector<8x128xf32>
    %282 = arith.select %279, %281, %224 : vector<8x128xi1>, vector<8x128xf32>
    %c9_159 = arith.constant 9 : index
    %c0_160 = arith.constant 0 : index
    %c0_161 = arith.constant 0 : index
    %283 = vector.load %arg3[%c9_159, %c0_160, %c0_161] : memref<16x8x128xf32, #tpu.memory_space<vmem>>, vector<1x8x128xf32>
    %284 = vector.shape_cast %283 : vector<1x8x128xf32> to vector<8x128xf32>
    %285 = arith.select %279, %284, %226 : vector<8x128xi1>, vector<8x128xf32>
    %c10_162 = arith.constant 10 : index
    %c0_163 = arith.constant 0 : index
    %c0_164 = arith.constant 0 : index
    %286 = vector.load %arg3[%c10_162, %c0_163, %c0_164] : memref<16x8x128xf32, #tpu.memory_space<vmem>>, vector<1x8x128xf32>
    %287 = vector.shape_cast %286 : vector<1x8x128xf32> to vector<8x128xf32>
    %288 = arith.select %279, %287, %228 : vector<8x128xi1>, vector<8x128xf32>
    %c11_165 = arith.constant 11 : index
    %c0_166 = arith.constant 0 : index
    %c0_167 = arith.constant 0 : index
    %289 = vector.load %arg3[%c11_165, %c0_166, %c0_167] : memref<16x8x128xf32, #tpu.memory_space<vmem>>, vector<1x8x128xf32>
    %290 = vector.shape_cast %289 : vector<1x8x128xf32> to vector<8x128xf32>
    %291 = arith.select %279, %290, %230 : vector<8x128xi1>, vector<8x128xf32>
    %c12_168 = arith.constant 12 : index
    %c0_169 = arith.constant 0 : index
    %c0_170 = arith.constant 0 : index
    %292 = vector.load %arg3[%c12_168, %c0_169, %c0_170] : memref<16x8x128xf32, #tpu.memory_space<vmem>>, vector<1x8x128xf32>
    %293 = vector.shape_cast %292 : vector<1x8x128xf32> to vector<8x128xf32>
    %294 = arith.select %279, %293, %232 : vector<8x128xi1>, vector<8x128xf32>
    %c13_171 = arith.constant 13 : index
    %c0_172 = arith.constant 0 : index
    %c0_173 = arith.constant 0 : index
    %295 = vector.load %arg3[%c13_171, %c0_172, %c0_173] : memref<16x8x128xf32, #tpu.memory_space<vmem>>, vector<1x8x128xf32>
    %296 = vector.shape_cast %295 : vector<1x8x128xf32> to vector<8x128xf32>
    %297 = arith.select %279, %296, %234 : vector<8x128xi1>, vector<8x128xf32>
    %c14_174 = arith.constant 14 : index
    %c0_175 = arith.constant 0 : index
    %c0_176 = arith.constant 0 : index
    %298 = vector.load %arg3[%c14_174, %c0_175, %c0_176] : memref<16x8x128xf32, #tpu.memory_space<vmem>>, vector<1x8x128xf32>
    %299 = vector.shape_cast %298 : vector<1x8x128xf32> to vector<8x128xf32>
    %300 = arith.select %279, %299, %236 : vector<8x128xi1>, vector<8x128xf32>
    %c15_177 = arith.constant 15 : index
    %c0_178 = arith.constant 0 : index
    %c0_179 = arith.constant 0 : index
    %301 = vector.load %arg3[%c15_177, %c0_178, %c0_179] : memref<16x8x128xf32, #tpu.memory_space<vmem>>, vector<1x8x128xf32>
    %302 = vector.shape_cast %301 : vector<1x8x128xf32> to vector<8x128xf32>
    %303 = arith.select %279, %302, %238 : vector<8x128xi1>, vector<8x128xf32>
    %cst_180 = arith.constant 0.000000e+00 : f32
    %304 = vector.broadcast %cst_180 : f32 to vector<8x128xf32>
    %305 = arith.cmpf ogt, %294, %304 : vector<8x128xf32>
    %306 = arith.extui %305 : vector<8x128xi1> to vector<8x128xi32>
    %307 = arith.sitofp %306 : vector<8x128xi32> to vector<8x128xf32>
    %308 = arith.subf %282, %205 : vector<8x128xf32>
    %309 = arith.mulf %308, %308 : vector<8x128xf32>
    %310 = arith.subf %285, %207 : vector<8x128xf32>
    %311 = arith.mulf %310, %310 : vector<8x128xf32>
    %312 = arith.addf %309, %311 : vector<8x128xf32>
    %cst_181 = arith.constant 5.000000e-01 : f32
    %313 = vector.broadcast %cst_181 : f32 to vector<8x128xf32>
    %314 = arith.mulf %288, %313 : vector<8x128xf32>
    %315 = math.exp %314 : vector<8x128xf32>
    %cst_182 = arith.constant 5.000000e-01 : f32
    %316 = vector.broadcast %cst_182 : f32 to vector<8x128xf32>
    %317 = arith.mulf %209, %316 : vector<8x128xf32>
    %318 = math.exp %317 : vector<8x128xf32>
    %319 = arith.subf %315, %318 : vector<8x128xf32>
    %320 = arith.mulf %319, %319 : vector<8x128xf32>
    %321 = arith.addf %312, %320 : vector<8x128xf32>
    %cst_183 = arith.constant 5.000000e-01 : f32
    %322 = vector.broadcast %cst_183 : f32 to vector<8x128xf32>
    %323 = arith.mulf %291, %322 : vector<8x128xf32>
    %324 = math.exp %323 : vector<8x128xf32>
    %cst_184 = arith.constant 5.000000e-01 : f32
    %325 = vector.broadcast %cst_184 : f32 to vector<8x128xf32>
    %326 = arith.mulf %211, %325 : vector<8x128xf32>
    %327 = math.exp %326 : vector<8x128xf32>
    %328 = arith.subf %324, %327 : vector<8x128xf32>
    %329 = arith.mulf %328, %328 : vector<8x128xf32>
    %330 = arith.addf %321, %329 : vector<8x128xf32>
    %331 = arith.subf %294, %213 : vector<8x128xf32>
    %cst_185 = arith.constant 5.000000e-01 : f32
    %332 = vector.broadcast %cst_185 : f32 to vector<8x128xf32>
    %333 = arith.mulf %332, %307 : vector<8x128xf32>
    %cst_186 = arith.constant 5.000000e-01 : f32
    %334 = vector.broadcast %cst_186 : f32 to vector<8x128xf32>
    %335 = arith.addf %334, %333 : vector<8x128xf32>
    %336 = arith.mulf %331, %331 : vector<8x128xf32>
    %337 = arith.mulf %335, %336 : vector<8x128xf32>
    %cst_187 = arith.constant 5.000000e+00 : f32
    %338 = vector.broadcast %cst_187 : f32 to vector<8x128xf32>
    %339 = arith.mulf %338, %307 : vector<8x128xf32>
    %340 = arith.mulf %339, %330 : vector<8x128xf32>
    %341 = arith.addf %176, %340 : vector<8x128xf32>
    %342 = arith.addf %341, %337 : vector<8x128xf32>
    %c13_188 = arith.constant 13 : index
    %c0_189 = arith.constant 0 : index
    %c0_190 = arith.constant 0 : index
    %343 = vector.load %arg2[%c13_188, %c0_189, %c0_190] : memref<16x8x128xf32, #tpu.memory_space<vmem>>, vector<1x8x128xf32>
    %344 = vector.shape_cast %343 : vector<1x8x128xf32> to vector<8x128xf32>
    %c14_191 = arith.constant 14 : index
    %c0_192 = arith.constant 0 : index
    %c0_193 = arith.constant 0 : index
    %345 = vector.load %arg2[%c14_191, %c0_192, %c0_193] : memref<16x8x128xf32, #tpu.memory_space<vmem>>, vector<1x8x128xf32>
    %346 = vector.shape_cast %345 : vector<1x8x128xf32> to vector<8x128xf32>
    %c15_194 = arith.constant 15 : index
    %c0_195 = arith.constant 0 : index
    %c0_196 = arith.constant 0 : index
    %347 = vector.load %arg2[%c15_194, %c0_195, %c0_196] : memref<16x8x128xf32, #tpu.memory_space<vmem>>, vector<1x8x128xf32>
    %348 = vector.shape_cast %347 : vector<1x8x128xf32> to vector<8x128xf32>
    %349 = arith.maximumf %344, %346 : vector<8x128xf32>
    %350 = arith.maximumf %349, %348 : vector<8x128xf32>
    %351 = arith.subf %344, %350 : vector<8x128xf32>
    %352 = math.exp %351 : vector<8x128xf32>
    %353 = arith.subf %346, %350 : vector<8x128xf32>
    %354 = math.exp %353 : vector<8x128xf32>
    %355 = arith.addf %352, %354 : vector<8x128xf32>
    %356 = arith.subf %348, %350 : vector<8x128xf32>
    %357 = math.exp %356 : vector<8x128xf32>
    %358 = arith.addf %355, %357 : vector<8x128xf32>
    %359 = math.log %358 : vector<8x128xf32>
    %360 = arith.addf %350, %359 : vector<8x128xf32>
    %361 = arith.cmpf ogt, %300, %297 : vector<8x128xf32>
    %362 = arith.select %361, %300, %297 : vector<8x128xi1>, vector<8x128xf32>
    %363 = arith.select %361, %346, %344 : vector<8x128xi1>, vector<8x128xf32>
    %364 = arith.cmpf ogt, %303, %362 : vector<8x128xf32>
    %365 = arith.select %364, %348, %363 : vector<8x128xi1>, vector<8x128xf32>
    %366 = arith.subf %360, %365 : vector<8x128xf32>
    %367 = arith.mulf %307, %366 : vector<8x128xf32>
    %368 = arith.addf %202, %367 : vector<8x128xf32>
    %369 = arith.addf %203, %307 : vector<8x128xf32>
    %c0_197 = arith.constant 0 : index
    %c0_198 = arith.constant 0 : index
    %370 = vector.load %arg5[%c0_197, %c0_198] : memref<8x128xf32, #tpu.memory_space<vmem>>, vector<8x128xf32>
    %371 = arith.addf %370, %342 : vector<8x128xf32>
    %c0_199 = arith.constant 0 : index
    %c0_200 = arith.constant 0 : index
    %372 = vector.load %arg5[%c0_199, %c0_200] : memref<8x128xf32, #tpu.memory_space<vmem>>, vector<8x128xf32>
    tpu.vector_store %arg5[%c0_199, %c0_200], %371 {strides = array<i32>} : memref<8x128xf32, #tpu.memory_space<vmem>>, vector<8x128xf32>,
    %c0_201 = arith.constant 0 : index
    %c0_202 = arith.constant 0 : index
    %373 = vector.load %arg6[%c0_201, %c0_202] : memref<8x128xf32, #tpu.memory_space<vmem>>, vector<8x128xf32>
    %374 = arith.addf %373, %368 : vector<8x128xf32>
    %c0_203 = arith.constant 0 : index
    %c0_204 = arith.constant 0 : index
    %375 = vector.load %arg6[%c0_203, %c0_204] : memref<8x128xf32, #tpu.memory_space<vmem>>, vector<8x128xf32>
    tpu.vector_store %arg6[%c0_203, %c0_204], %374 {strides = array<i32>} : memref<8x128xf32, #tpu.memory_space<vmem>>, vector<8x128xf32>,
    %c0_205 = arith.constant 0 : index
    %c0_206 = arith.constant 0 : index
    %376 = vector.load %arg7[%c0_205, %c0_206] : memref<8x128xf32, #tpu.memory_space<vmem>>, vector<8x128xf32>
    %377 = arith.addf %376, %369 : vector<8x128xf32>
    %c0_207 = arith.constant 0 : index
    %c0_208 = arith.constant 0 : index
    %378 = vector.load %arg7[%c0_207, %c0_208] : memref<8x128xf32, #tpu.memory_space<vmem>>, vector<8x128xf32>
    tpu.vector_store %arg7[%c0_207, %c0_208], %377 {strides = array<i32>} : memref<8x128xf32, #tpu.memory_space<vmem>>, vector<8x128xf32>,
    %c0_i32_209 = arith.constant 0 : i32
    %379 = arith.cmpi eq, %arg1, %c0_i32_209 : i32
    %380 = arith.extui %379 : i1 to i32
    %c0_i32_210 = arith.constant 0 : i32
    %381 = arith.cmpi ne, %380, %c0_i32_210 : i32
    scf.if %381 {
      %c0_211 = arith.constant 0 : index
      %c0_212 = arith.constant 0 : index
      %382 = vector.load %arg5[%c0_211, %c0_212] : memref<8x128xf32, #tpu.memory_space<vmem>>, vector<8x128xf32>
      %383 = vector.shape_cast %382 : vector<8x128xf32> to vector<1x8x128xf32>
      %cst_213 = arith.constant dense<0.000000e+00> : vector<1xf32>
      %384 = vector.multi_reduction <add>, %383, %cst_213 [1, 2] : vector<1x8x128xf32> to vector<1xf32>
      %385 = vector.shape_cast %384 : vector<1xf32> to vector<1x1x1xf32>
      %386 = vector.extract %385[0, 0, 0] : f32 from vector<1x1x1xf32>
      %c0_214 = arith.constant 0 : index
      %c0_215 = arith.constant 0 : index
      %387 = vector.load %arg6[%c0_214, %c0_215] : memref<8x128xf32, #tpu.memory_space<vmem>>, vector<8x128xf32>
      %388 = vector.shape_cast %387 : vector<8x128xf32> to vector<1x8x128xf32>
      %cst_216 = arith.constant dense<0.000000e+00> : vector<1xf32>
      %389 = vector.multi_reduction <add>, %388, %cst_216 [1, 2] : vector<1x8x128xf32> to vector<1xf32>
      %390 = vector.shape_cast %389 : vector<1xf32> to vector<1x1x1xf32>
      %391 = vector.extract %390[0, 0, 0] : f32 from vector<1x1x1xf32>
      %c0_217 = arith.constant 0 : index
      %c0_218 = arith.constant 0 : index
      %392 = vector.load %arg7[%c0_217, %c0_218] : memref<8x128xf32, #tpu.memory_space<vmem>>, vector<8x128xf32>
      %393 = vector.shape_cast %392 : vector<8x128xf32> to vector<1x8x128xf32>
      %cst_219 = arith.constant dense<0.000000e+00> : vector<1xf32>
      %394 = vector.multi_reduction <add>, %393, %cst_219 [1, 2] : vector<1x8x128xf32> to vector<1xf32>
      %395 = vector.shape_cast %394 : vector<1xf32> to vector<1x1x1xf32>
      %396 = vector.extract %395[0, 0, 0] : f32 from vector<1x1x1xf32>
      %397 = tpu.iota {dimensions = array<i32: 0>} : vector<8x128xi32>
      %398 = tpu.iota {dimensions = array<i32: 1>} : vector<8x128xi32>
      %c0_i32_220 = arith.constant 0 : i32
      %399 = vector.broadcast %c0_i32_220 : i32 to vector<8x128xi32>
      %400 = arith.cmpi eq, %397, %399 : vector<8x128xi32>
      %c0_i32_221 = arith.constant 0 : i32
      %401 = vector.broadcast %c0_i32_221 : i32 to vector<8x128xi32>
      %402 = arith.cmpi eq, %398, %401 : vector<8x128xi32>
      %403 = arith.andi %400, %402 : vector<8x128xi1>
      %c0_i32_222 = arith.constant 0 : i32
      %404 = vector.broadcast %c0_i32_222 : i32 to vector<8x128xi32>
      %405 = arith.cmpi eq, %397, %404 : vector<8x128xi32>
      %c1_i32 = arith.constant 1 : i32
      %406 = vector.broadcast %c1_i32 : i32 to vector<8x128xi32>
      %407 = arith.cmpi eq, %398, %406 : vector<8x128xi32>
      %408 = arith.andi %405, %407 : vector<8x128xi1>
      %c0_i32_223 = arith.constant 0 : i32
      %409 = vector.broadcast %c0_i32_223 : i32 to vector<8x128xi32>
      %410 = arith.cmpi eq, %397, %409 : vector<8x128xi32>
      %c2_i32 = arith.constant 2 : i32
      %411 = vector.broadcast %c2_i32 : i32 to vector<8x128xi32>
      %412 = arith.cmpi eq, %398, %411 : vector<8x128xi32>
      %413 = arith.andi %410, %412 : vector<8x128xi1>
      %cst_224 = arith.constant 0.000000e+00 : f32
      %414 = vector.broadcast %396 : f32 to vector<8x128xf32>
      %415 = vector.broadcast %cst_224 : f32 to vector<8x128xf32>
      %416 = arith.select %413, %414, %415 : vector<8x128xi1>, vector<8x128xf32>
      %417 = vector.broadcast %391 : f32 to vector<8x128xf32>
      %418 = arith.select %408, %417, %416 : vector<8x128xi1>, vector<8x128xf32>
      %419 = vector.broadcast %386 : f32 to vector<8x128xf32>
      %420 = arith.select %403, %419, %418 : vector<8x128xi1>, vector<8x128xf32>
      %421 = vector.shape_cast %420 : vector<8x128xf32> to vector<1x8x128xf32>
      %c0_225 = arith.constant 0 : index
      %c0_226 = arith.constant 0 : index
      %c0_227 = arith.constant 0 : index
      %422 = vector.load %arg4[%c0_225, %c0_226, %c0_227] : memref<1x8x128xf32, #tpu.memory_space<vmem>>, vector<1x8x128xf32>
      tpu.vector_store %arg4[%c0_225, %c0_226, %c0_227], %421 {strides = array<i32>} : memref<1x8x128xf32, #tpu.memory_space<vmem>>, vector<1x8x128xf32>,
    } else {
    }
    return
  }
  func.func @transform_0(%arg0: i32, %arg1: i32) -> (i32, i32, i32) {
    %c1_i32 = arith.constant 1 : i32
    %0 = arith.muli %arg0, %c1_i32 : i32
    %1 = arith.addi %0, %arg1 : i32
    %c0_i32 = arith.constant 0 : i32
    %c0_i32_0 = arith.constant 0 : i32
    %c0_i32_1 = arith.constant 0 : i32
    return %c0_i32, %1, %c0_i32_0 : i32, i32, i32
  }
  func.func @transform_1(%arg0: i32, %arg1: i32) -> (i32, i32, i32) {
    %c1_i32 = arith.constant 1 : i32
    %0 = arith.muli %arg0, %c1_i32 : i32
    %1 = arith.addi %0, %arg1 : i32
    %c0_i32 = arith.constant 0 : i32
    %c0_i32_0 = arith.constant 0 : i32
    %c0_i32_1 = arith.constant 0 : i32
    return %c0_i32, %1, %c0_i32_0 : i32, i32, i32
  }
  func.func @transform_2(%arg0: i32, %arg1: i32) -> (i32, i32, i32) {
    %c0_i32 = arith.constant 0 : i32
    %c0_i32_0 = arith.constant 0 : i32
    %c0_i32_1 = arith.constant 0 : i32
    return %arg0, %c0_i32, %c0_i32_0 : i32, i32, i32
  }
}

</mosaic_0001>

<bundles_post_ra>
// kernel: yolo_loss_pallas.1
= control target key start
LH: loop header
LB: loop body
LE: loop exit
PB: predicated region body
PF: predicated region fallthrough
CT: control target
= control target key end

     0   :  { %s1001_s9 = smov 0   ;;  %s1003_s10 = smov 0   ;;  %s1364_s0 = inlined_call_operand.vmem [shape: f32[16,16,128], index: 0, kind: input, shape index: {}]   ;;  %s1365_s1 = inlined_call_operand.vmem [shape: f32[16,16,128], index: 1, kind: input, shape index: {}]   ;;  %s1366_s2 = inlined_call_operand.vmem [shape: f32[2,8,128], index: 2, kind: output, shape index: {}]  }
   0x1   :  { %s1005_s11 = smov 0   ;;  %s1007_s12 = smov 0  }
   0x2   :  { %s1009_s13 = smov 0  }
   0x3 LB: > { %s24_s14 = sadd.s32 1, %s979_s12  ;;  %p40_p1 = scmp.ne.s32.totalorder %s971_s10, %s967_s9  ;;  %s983_s13 = sphi %s1009_s13, %s12_s13   ;;  %s979_s12 = sphi %s1007_s12, %s1377_s12   ;;  %s975_s11 = sphi %s1005_s11, %s1376_s11   ;;  %s971_s10 = sphi %s1003_s10, %s1375_s10   ;;  %s967_s9 = sphi %s1001_s9, %s1374_s9  }
   0x4   : > { %p26_p0 = scmp.ge.s32.totalorder %s24_s14, 2  ;;  %p41_p2 = scmp.eq.s32.totalorder %s983_s13, 0 }
   0x5   : > { %s33_s17 = sadd.s32 1, %s971_s10  ;;  %p815_p5 = scmp.ge.s32.totalorder %s983_s13, 2 }
   0x6   : > { %s1379_s14 = smov (%p26_p0, %s24_s14), 0  ;;  %p1032_p3 = por %p41_p2, %p40_p1 }
   0x7   : > { %s30_s16 = ssub.s32 %s979_s12, %s1379_s14  ;;  %120 = sbr.rel (%p815_p5) target bundleno = 38 (0x26), region = 16 }
   0x8   : > { %p31_p4 = scmp.eq.s32.totalorder %s30_s16, 0 }
   0xa   : > { %s1040_s18 = scalar_select %p31_p4, %s971_s10, %s33_s17  }
   0xe   : > { %123 = sbr.rel (!%p1032_p3) target bundleno = 26 (0x1a), region = 20  ;;  %s125_s19 = sand.u32 (%p1032_p3), 1, %s971_s10  }
   0xf   : > { %s817_s20 = sshll.u32 (%p1032_p3), %s979_s12, 3  ;;  %s816_s21 = sshll.u32 (%p1032_p3), %s125_s19, 7 }
  0x10   : > { %s1050_s24 = scalar_lea.vmem (%p1032_p3), %s1364_s0, %s817_s20  ;;  %s127_s25 = scalar_lea.vmem (%p1032_p3), [#allocation5], %s816_s21 }
  0x11   : > { %v188_v0 = vld [vmem:[%s1050_s24] sm:$0xff] (%p1032_p3)  ;;  %v190_v1 = vld [vmem:[%s1050_s24 + $0x10] sm:$0xff] (%p1032_p3) }
  0x12   : > { %v192_v2 = vld [vmem:[%s1050_s24 + $0x20] sm:$0xff] (%p1032_p3)  ;;  %189 = vst [vmem:[%s127_s25] sm:$0xff] (%p1032_p3), %v188_v0  ;;  %191 = vst [vmem:[%s127_s25 + $0x8] sm:$0xff] (%p1032_p3), %v190_v1  ;;  %v194_v3 = vld [vmem:[%s1050_s24 + $0x30] sm:$0xff] (%p1032_p3) }
  0x13   : > { %193 = vst [vmem:[%s127_s25 + $0x10] sm:$0xff] (%p1032_p3), %v192_v2  ;;  %v196_v4 = vld [vmem:[%s1050_s24 + $0x40] sm:$0xff] (%p1032_p3)  ;;  %v198_v5 = vld [vmem:[%s1050_s24 + $0x50] sm:$0xff] (%p1032_p3)  ;;  %195 = vst [vmem:[%s127_s25 + $0x18] sm:$0xff] (%p1032_p3), %v194_v3 }
  0x14   : > { %197 = vst [vmem:[%s127_s25 + $0x20] sm:$0xff] (%p1032_p3), %v196_v4  ;;  %199 = vst [vmem:[%s127_s25 + $0x28] sm:$0xff] (%p1032_p3), %v198_v5  ;;  %v200_v6 = vld [vmem:[%s1050_s24 + $0x60] sm:$0xff] (%p1032_p3)  ;;  %v202_v7 = vld [vmem:[%s1050_s24 + $0x70] sm:$0xff] (%p1032_p3) }
  0x15   : > { %v204_v8 = vld [vmem:[%s1050_s24 + $0x80] sm:$0xff]  ;;  %201 = vst [vmem:[%s127_s25 + $0x30] sm:$0xff] %v200_v6  ;;  %203 = vst [vmem:[%s127_s25 + $0x38] sm:$0xff] %v202_v7  ;;  %v206_v9 = vld [vmem:[%s1050_s24 + $0x90] sm:$0xff] }
  0x16   : > { %205 = vst [vmem:[%s127_s25 + $0x40] sm:$0xff] %v204_v8  ;;  %v208_v10 = vld [vmem:[%s1050_s24 + $0xa0] sm:$0xff]  ;;  %v210_v11 = vld [vmem:[%s1050_s24 + $0xb0] sm:$0xff]  ;;  %207 = vst [vmem:[%s127_s25 + $0x48] sm:$0xff] %v206_v9 }
  0x17   : > { %209 = vst [vmem:[%s127_s25 + $0x50] sm:$0xff] %v208_v10  ;;  %211 = vst [vmem:[%s127_s25 + $0x58] sm:$0xff] %v210_v11  ;;  %v212_v12 = vld [vmem:[%s1050_s24 + $0xc0] sm:$0xff]  ;;  %v214_v13 = vld [vmem:[%s1050_s24 + $0xd0] sm:$0xff] }
  0x18   : > { %v216_v14 = vld [vmem:[%s1050_s24 + $0xe0] sm:$0xff]  ;;  %213 = vst [vmem:[%s127_s25 + $0x60] sm:$0xff] %v212_v12  ;;  %215 = vst [vmem:[%s127_s25 + $0x68] sm:$0xff] %v214_v13  ;;  %v218_v15 = vld [vmem:[%s1050_s24 + $0xf0] sm:$0xff] }
  0x19   : > { %217 = vst [vmem:[%s127_s25 + $0x70] sm:$0xff] %v216_v14  ;;  %219 = vst [vmem:[%s127_s25 + $0x78] sm:$0xff] %v218_v15 }
  0x1a PF: > { %225 = sbr.rel (!%p1032_p3) target bundleno = 38 (0x26), region = 58  ;;  %s227_s26 = sand.u32 (%p1032_p3), 1, %s971_s10  }
  0x1b   : > { %s819_s27 = sshll.u32 (%p1032_p3), %s979_s12, 3  ;;  %s818_s28 = sshll.u32 (%p1032_p3), %s227_s26, 7 }
  0x1c   : > { %s1075_s3 = scalar_lea.vmem (%p1032_p3), %s1365_s1, %s819_s27  ;;  %s229_s4 = scalar_lea.vmem (%p1032_p3), [#allocation6], %s818_s28 }
  0x1d   : > { %v290_v16 = vld [vmem:[%s1075_s3] sm:$0xff] (%p1032_p3)  ;;  %v292_v17 = vld [vmem:[%s1075_s3 + $0x10] sm:$0xff] (%p1032_p3) }
  0x1e   : > { %v294_v18 = vld [vmem:[%s1075_s3 + $0x20] sm:$0xff] (%p1032_p3)  ;;  %291 = vst [vmem:[%s229_s4] sm:$0xff] (%p1032_p3), %v290_v16  ;;  %293 = vst [vmem:[%s229_s4 + $0x8] sm:$0xff] (%p1032_p3), %v292_v17  ;;  %v296_v19 = vld [vmem:[%s1075_s3 + $0x30] sm:$0xff] (%p1032_p3) }
  0x1f   : > { %295 = vst [vmem:[%s229_s4 + $0x10] sm:$0xff] (%p1032_p3), %v294_v18  ;;  %v298_v20 = vld [vmem:[%s1075_s3 + $0x40] sm:$0xff] (%p1032_p3)  ;;  %v300_v21 = vld [vmem:[%s1075_s3 + $0x50] sm:$0xff] (%p1032_p3)  ;;  %297 = vst [vmem:[%s229_s4 + $0x18] sm:$0xff] (%p1032_p3), %v296_v19 }
  0x20   : > { %299 = vst [vmem:[%s229_s4 + $0x20] sm:$0xff] (%p1032_p3), %v298_v20  ;;  %301 = vst [vmem:[%s229_s4 + $0x28] sm:$0xff] (%p1032_p3), %v300_v21  ;;  %v302_v22 = vld [vmem:[%s1075_s3 + $0x60] sm:$0xff] (%p1032_p3)  ;;  %v304_v23 = vld [vmem:[%s1075_s3 + $0x70] sm:$0xff] (%p1032_p3) }
  0x21   : > { %v306_v24 = vld [vmem:[%s1075_s3 + $0x80] sm:$0xff]  ;;  %303 = vst [vmem:[%s229_s4 + $0x30] sm:$0xff] %v302_v22  ;;  %305 = vst [vmem:[%s229_s4 + $0x38] sm:$0xff] %v304_v23  ;;  %v308_v25 = vld [vmem:[%s1075_s3 + $0x90] sm:$0xff] }
  0x22   : > { %307 = vst [vmem:[%s229_s4 + $0x40] sm:$0xff] %v306_v24  ;;  %v310_v26 = vld [vmem:[%s1075_s3 + $0xa0] sm:$0xff]  ;;  %v312_v27 = vld [vmem:[%s1075_s3 + $0xb0] sm:$0xff]  ;;  %309 = vst [vmem:[%s229_s4 + $0x48] sm:$0xff] %v308_v25 }
  0x23   : > { %311 = vst [vmem:[%s229_s4 + $0x50] sm:$0xff] %v310_v26  ;;  %313 = vst [vmem:[%s229_s4 + $0x58] sm:$0xff] %v312_v27  ;;  %v314_v28 = vld [vmem:[%s1075_s3 + $0xc0] sm:$0xff]  ;;  %v316_v29 = vld [vmem:[%s1075_s3 + $0xd0] sm:$0xff] }
  0x24   : > { %v318_v30 = vld [vmem:[%s1075_s3 + $0xe0] sm:$0xff]  ;;  %315 = vst [vmem:[%s229_s4 + $0x60] sm:$0xff] %v314_v28  ;;  %317 = vst [vmem:[%s229_s4 + $0x68] sm:$0xff] %v316_v29  ;;  %v320_v31 = vld [vmem:[%s1075_s3 + $0xf0] sm:$0xff] }
  0x25   : > { %319 = vst [vmem:[%s229_s4 + $0x70] sm:$0xff] %v318_v30  ;;  %321 = vst [vmem:[%s229_s4 + $0x78] sm:$0xff] %v320_v31 }
  0x26 PF: > { %p820_p6 = scmp.ge.s32.totalorder %s983_s13, 1  ;;  %p326_p7 = scmp.lt.s32.totalorder %s983_s13, 3 }
  0x28   : > { %p327_p8 = pnand %p820_p6, %p326_p7 }
  0x29   : > { %s333_s5 = sand.u32 (!%p327_p8), 1, %s967_s9   ;;  %p366_p9 = scmp.lt.s32.totalorder (!%p327_p8), %s975_s11, 1 }
  0x2a   : > { %330 = sbr.rel (%p327_p8) target bundleno = 330 (0x14a), region = 96  ;;  %s821_s6 = sshll.u32 (!%p327_p8), %s333_s5, 7 }
  0x2b   : > { %s1096_s7 = scalar_lea.vmem (!%p327_p8), [#allocation6], %s821_s6  ;;  %s1130_s8 = scalar_lea.vmem (!%p327_p8), [#allocation5], %s821_s6 }
  0x2c   : > { %v1099_v32 = vld [vmem:[%s1096_s7] sm:$0xff] (!%p327_p8)  ;;  %v1102_v33 = vld [vmem:[%s1096_s7 + $0x10] sm:$0xff] (!%p327_p8)  ;;  %v1105_v34 = vld [vmem:[%s1096_s7 + $0x8] sm:$0xff] (!%p327_p8) }
  0x2d   : > { %v1108_v35 = vld [vmem:[%s1096_s7 + $0x18] sm:$0xff] (!%p327_p8)  ;;  %v384_v36 = vmul.f32 (!%p327_p8), 0.5, %v1102_v33  ;;  %v1112_v37 = vld [vmem:[%s1096_s7 + $0x40] sm:$0xff] (!%p327_p8)  ;;  %v1116_v39 = vld [vmem:[%s1096_s7 + $0x48] sm:$0xff] (!%p327_p8) }
  0x2e   : > { %v385_v38 = vmul.f32 (!%p327_p8), 0.5, %v1108_v35  ;;  %v1119_v40 = vld [vmem:[%s1096_s7 + $0x50] sm:$0xff] (!%p327_p8)  ;;  %v1122_v41 = vld [vmem:[%s1096_s7 + $0x58] sm:$0xff] (!%p327_p8)  ;;  %v1126_v42 = vmul.f32 (!%p327_p8), %v1108_v35, %v1102_v33  ;;  %v1133_v45 = vld [vmem:[%s1130_s8] sm:$0xff] (!%p327_p8) }
  0x2f   : > { %v399_v43 = vmul.f32 (!%p327_p8), 0.5, %v1119_v40  ;;  %v400_v44 = vmul.f32 (!%p327_p8), 0.5, %v1122_v41  ;;  %v832_v46 = vld [vmem:[%s1130_s8 + $0x10] sm:$0xff] (!%p327_p8)  ;;  %v833_v47 = vld [vmem:[%s1130_s8 + $0x18] sm:$0xff] (!%p327_p8)  ;;  %v386_v48 = vsub.f32 (!%p327_p8), %v1099_v32, %v384_v36  ;;  %v388_v50 = vadd.f32 (!%p327_p8), %v384_v36, %v1099_v32  ;;  %v1147_v56 = vld [vmem:[%s1130_s8 + $0x8] sm:$0xff] (!%p327_p8) }
  0x30   : > { %v387_v49 = vsub.f32 (!%p327_p8), %v1105_v34, %v385_v38  ;;  %v1140_v51 = vmul.f32 (!%p327_p8), 0.5, %v832_v46  ;;  %v389_v52 = vadd.f32 (!%p327_p8), %v1105_v34, %v385_v38  ;;  %v849_v57 = vld [vmem:[%s1130_s8 + $0x50] sm:$0xff] (!%p327_p8)  ;;  %v1150_v58 = vmul.f32 (!%p327_p8), 0.5, %v833_v47  ;;  %v850_v62 = vld [vmem:[%s1130_s8 + $0x58] sm:$0xff] (!%p327_p8)  ;;  %v1169_v7 = vld [vmem:[%s1130_s8 + $0x40] sm:$0xff] (!%p327_p8) }
  0x31   : > { %v401_v53 = vsub.f32 %v1112_v37, %v399_v43  ;;  %v403_v54 = vadd.f32 %v1112_v37, %v399_v43  ;;  %v404_v55 = vadd.f32 %v1116_v39, %v400_v44  ;;  %v421_v61 = vmul.f32 %v833_v47, %v832_v46  ;;  %v1172_v8 = vld [vmem:[%s1130_s8 + $0x48] sm:$0xff]  ;;  %s1381_s11 = smov (!%p366_p9, %s975_s11), 1 }
  0x32   : > { %v417_v59 = vsub.f32 %v1133_v45, %v1140_v51  ;;  %v419_v60 = vadd.f32 %v1140_v51, %v1133_v45  ;;  %v402_v63 = vsub.f32 %v1116_v39, %v400_v44  ;;  %v405_v0 = vmul.f32 %v1122_v41, %v1119_v40  ;;  %s823_s16 = sshll.u32 %s1381_s11, 3 }
  0x33   : > { %v1160_v1 = vmul.f32 0.5, %v849_v57  ;;  %v1162_v2 = vmul.f32 0.5, %v850_v62  ;;  %v418_v3 = vsub.f32 %v1147_v56, %v1150_v58  ;;  %v420_v4 = vadd.f32 %v1147_v56, %v1150_v58  ;;  %s369_s21 = scalar_lea.vmem %s1366_s2, %s823_s16 }
  0x34   : > { %v430_v5 = vmin.f32 %v419_v60, %v388_v50  ;;  %v431_v6 = vmax.f32 %v417_v59, %v386_v48  ;;  %v439_v9 = vadd.f32 %v421_v61, %v1126_v42  ;;  %v446_v10 = vmin.f32 %v419_v60, %v403_v54 }
  0x35   : > { %v447_v11 = vmax.f32 %v417_v59, %v401_v53  ;;  %v559_v12 = vmul.f32 %v850_v62, %v849_v57  ;;  %v434_v14 = vmin.f32 %v420_v4, %v389_v52  ;;  %v435_v15 = vmax.f32 %v418_v3, %v387_v49 }
  0x36   : > { %v432_v13 = vsub.f32 %v430_v5, %v431_v6  ;;  %v450_v16 = vmin.f32 %v420_v4, %v404_v55  ;;  %v451_v18 = vmax.f32 %v418_v3, %v402_v63  ;;  %v555_v19 = vsub.f32 %v1169_v7, %v1160_v1  ;;  %v1185_v4 = vld [vmem:[%s1130_s8 + $0x28] sm:$0xff] }
  0x37   : > { %v448_v17 = vsub.f32 %v446_v10, %v447_v11  ;;  %v556_v20 = vsub.f32 %v1172_v8, %v1162_v2  ;;  %v436_v22 = vsub.f32 %v434_v14, %v435_v15  ;;  %v557_v23 = vadd.f32 %v1169_v7, %v1160_v1  ;;  %v1197_v11 = vld [vmem:[%s1130_s8 + $0x68] sm:$0xff] }
  0x38   : > { %v433_v21 = vmax.f32 %v432_v13, 0.0  ;;  %v558_v24 = vadd.f32 %v1172_v8, %v1162_v2  ;;  %v452_v26 = vsub.f32 %v450_v16, %v451_v18  ;;  %v561_v27 = vmax.f32 %v555_v19, %v386_v48  ;;  %v1200_v13 = vld [vmem:[%s1130_s8 + $0x70] sm:$0xff] }
  0x39   : > { %v449_v25 = vmax.f32 %v448_v17, 0.0  ;;  %v565_v28 = vmax.f32 %v556_v20, %v387_v49  ;;  %v437_v29 = vmax.f32 %v436_v22, 0.0  ;;  %v455_v30 = vadd.f32 %v421_v61, %v405_v0 }
  0x3a   : > { %v560_v31 = vmin.f32 %v557_v23, %v388_v50  ;;  %v564_v36 = vmin.f32 %v558_v24, %v389_v52  ;;  %v453_v38 = vmax.f32 %v452_v26, 0.0  ;;  %v576_v43 = vmin.f32 %v557_v23, %v403_v54  ;;  %v1188_v54 = vld [vmem:[%s1130_s8 + $0x30] sm:$0xff] }
  0x3b   : > { %v577_v44 = vmax.f32 %v555_v19, %v401_v53  ;;  %v580_v46 = vmin.f32 %v558_v24, %v404_v55  ;;  %v438_v47 = vmul.f32 %v437_v29, %v433_v21  ;;  %v581_v60 = vmax.f32 %v556_v20, %v402_v63  ;;  %v1210_v19 = vld [vmem:[%s1130_s8 + $0x78] sm:$0xff] }
  0x3c   : > { %v562_v57 = vsub.f32 %v560_v31, %v561_v27  ;;  %v566_v59 = vsub.f32 %v564_v36, %v565_v28  ;;  %v454_v62 = vmul.f32 %v453_v38, %v449_v25  ;;  %v569_v3 = vadd.f32 %v559_v12, %v1126_v42 }
  0x3d   : > { %v578_v48 = vsub.f32 %v576_v43, %v577_v44  ;;  %v440_v49 = vsub.f32 %v439_v9, %v438_v47  ;;  %v582_v52 = vsub.f32 %v580_v46, %v581_v60  ;;  %v585_v6 = vadd.f32 %v559_v12, %v405_v0  ;;  %v1192_v9 = vld [vmem:[%s1130_s8 + $0x38] sm:$0xff]  ;;  %v839_v60 = vld [vmem:[%s1096_s7 + $0x60] sm:$0xff] }
  0x3e   : > { %v563_v61 = vmax.f32 %v562_v57, 0.0  ;;  %v567_v50 = vmax.f32 %v566_v59, 0.0  ;;  %v456_v53 = vsub.f32 %v455_v30, %v454_v62  ;;  %v518_v10 = vmax.f32 %v1185_v4, %v1188_v54  ;;  %v835_v57 = vld [vmem:[%s1096_s7 + $0x20] sm:$0xff] }
  0x3f   : > { %v579_v55 = vmax.f32 %v578_v48, 0.0  ;;  %vm441_vm0 = vcmp.gt.f32.partialorder %v440_v49, 0.0  ;;  %v583_v63 = vmax.f32 %v582_v52, 0.0  ;;  %v640_v17 = vmax.f32 %v1197_v11, %v1200_v13 }
  0x40   : > { %v568_v5 = vmul.f32 %v567_v50, %v563_v61  ;;  %v442_v42 = vsel %vm441_vm0, %v440_v49, 1.0  ;;  %vm457_vm1 = vcmp.gt.f32.partialorder %v456_v53, 0.0  ;;  %v1204_v12 = vmax.f32 %v518_v10, %v1192_v9 }
  0x41   : > { %905 = vrcp.f32 %v442_v42  ;;  %v458_v14 = vsel %vm457_vm1, %v456_v53, 1.0  ;;  %v584_v16 = vmul.f32 %v583_v63, %v579_v55  ;;  %v1216_v22 = vmax.f32 %v640_v17, %v1210_v19 }
  0x42   : > { %v570_v15 = vsub.f32 %v569_v3, %v568_v5  ;;  %907 = vrcp.f32 %v458_v14  ;;  %v520_v21 = vsub.f32 %v1185_v4, %v1204_v12  ;;  %v523_v23 = vsub.f32 %v1188_v54, %v1204_v12 }
  0x43   : > { %v586_v0 = vsub.f32 %v585_v6, %v584_v16  ;;  %v527_v24 = vsub.f32 %v1192_v9, %v1204_v12  ;;  %v490_v25 = vmul.f32 1.442695, %v1140_v51  ;;  %v642_v28 = vsub.f32 %v1197_v11, %v1216_v22 }
  0x44   : > { %vm571_vm2 = vcmp.gt.f32.partialorder %v570_v15, 0.0  ;;  %v521_v27 = vmul.f32 1.442695, %v520_v21  ;;  %v524_v31 = vmul.f32 1.442695, %v523_v23  ;;  %v645_v36 = vsub.f32 %v1200_v13, %v1216_v22 }
  0x45   : > { %v572_v18 = vsel %vm571_vm2, %v570_v15, 1.0  ;;  %vm587_vm3 = vcmp.gt.f32.partialorder %v586_v0, 0.0  ;;  %v528_v43 = vmul.f32 1.442695, %v527_v24  ;;  %v649_v51 = vsub.f32 %v1210_v19, %v1216_v22 }
  0x46   : > { %909 = vrcp.f32 %v572_v18  ;;  %v588_v20 = vsel %vm587_vm3, %v586_v0, 1.0  ;;  %v643_v3 = vmul.f32 1.442695, %v642_v28  ;;  %v498_v63 = vmul.f32 1.442695, %v1150_v58 }
  0x47   : > { %911 = vrcp.f32 %v588_v20  ;;  %v650_v55 = vmul.f32 1.442695, %v649_v51  ;;  %v612_v15 = vmul.f32 1.442695, %v1160_v1  ;;  %v620_v58 = vmul.f32 1.442695, %v1162_v2 }
  0x48   : > { %913 = vpow2.f32 %v490_v25  ;;  %v985_v21 = vmov 0.0   ;;  %v837_v51 = vld [vmem:[%s1096_s7 + $0x30] sm:$0xff] }
  0x49   : > { %915 = vpow2.f32 %v521_v27 }
  0x4a   : > { %917 = vpow2.f32 %v524_v31 }
  0x4b   : > { %v906_v26 = vpop.eup %905  ;;  %919 = vpow2.f32 %v528_v43 }
  0x4c   : > { %v908_v29 = vpop.eup %907  ;;  %v444_v30 = vmul.f32 %v906_v26, %v438_v47  ;;  %921 = vpow2.f32 %v643_v3 }
  0x4d   : > { %v460_v38 = vmul.f32 %v908_v29, %v454_v62  ;;  %v646_v62 = vmul.f32 1.442695, %v645_v36 }
  0x4e   : > { %v445_v44 = vsel %vm441_vm0, %v444_v30, 0.0 }
  0x4f   : > { %v461_v59 = vsel %vm457_vm1, %v460_v38, 0.0  ;;  %923 = vpow2.f32 %v646_v62 }
  0x50   : > { %v910_v46 = vpop.eup %909  ;;  %vm1233_vm4 = vcmp.gt.f32.partialorder %v461_v59, %v445_v44  ;;  %925 = vpow2.f32 %v650_v55  ;;  %v836_v44 = vld [vmem:[%s1096_s7 + $0x28] sm:$0xff]  ;;  %v834_v59 = vld [vmem:[%s1130_s8 + $0x20] sm:$0xff] }
  0x51   : > { %v574_v48 = vmul.f32 %v910_v46, %v568_v5  ;;  %v912_v49 = vpop.eup %911  ;;  %v465_v61 = vsel %vm1233_vm4, %v1119_v40, %v1102_v33  ;;  %v1243_v50 = vsel %vm1233_vm4, %v839_v60, %v835_v57  ;;  %v466_v5 = vsel %vm1233_vm4, %v1122_v41, %v1108_v35  ;;  %v841_v46 = vld [vmem:[%s1096_s7 + $0x70] sm:$0xff] }
  0x52   : > { %v590_v53 = vmul.f32 %v912_v49, %v584_v16  ;;  %v487_v42 = vmul.f32 0.5, %v465_v61  ;;  %vm479_vm5 = vcmp.gt.f32.partialorder %v1243_v50, 0.0  ;;  %v495_v14 = vmul.f32 0.5, %v466_v5  ;;  %v914_v20 = vpop.eup %913 }
  0x53   : > { %v575_v52 = vsel %vm571_vm2, %v574_v48, 0.0  ;;  %v463_v0 = vsel %vm1233_vm4, %v1112_v37, %v1099_v32  ;;  %927 = vpow2.f32 %v498_v63  ;;  %v1268_v1 = vsel %vm479_vm5, 1.0, %v985_v21  ;;  %v916_v24 = vpop.eup %915 }
  0x54   : > { %v591_v6 = vsel %vm587_vm3, %v590_v53, 0.0  ;;  %v488_v17 = vmul.f32 1.442695, %v487_v42  ;;  %v496_v18 = vmul.f32 1.442695, %v495_v14  ;;  %v464_v2 = vsel %vm1233_vm4, %v1116_v39, %v1105_v34  ;;  %v918_v28 = vpop.eup %917 }
  0x55   : > { %vm1253_vm6 = vcmp.gt.f32.partialorder %v591_v6, %v575_v52  ;;  %v920_v31 = vpop.eup %919  ;;  %v482_v36 = vsub.f32 %v463_v0, %v1133_v45  ;;  %v484_v38 = vsub.f32 %v464_v2, %v1147_v56  ;;  %v840_v56 = vld [vmem:[%s1096_s7 + $0x68] sm:$0xff]  ;;  %v475_v49 = vsel %vm1233_vm4, %v841_v46, %v837_v51  ;;  %v851_v0 = vld [vmem:[%s1130_s8 + $0x60] sm:$0xff] }
  0x56   : > { %v1260_v16 = vsel %vm1253_vm6, %v839_v60, %v835_v57  ;;  %929 = vpow2.f32 %v488_v17  ;;  %v595_v26 = vsel %vm1253_vm6, %v1119_v40, %v1102_v33  ;;  %v596_v27 = vsel %vm1253_vm6, %v1122_v41, %v1108_v35  ;;  %v922_v43 = vpop.eup %921  ;;  %v842_v17 = vld [vmem:[%s1096_s7 + $0x78] sm:$0xff] }
  0x57   : > { %vm601_vm7 = vcmp.gt.f32.partialorder %v1260_v16, 0.0  ;;  %931 = vpow2.f32 %v496_v18  ;;  %v609_v29 = vmul.f32 0.5, %v595_v26  ;;  %v617_v30 = vmul.f32 0.5, %v596_v27 }
  0x58   : > { %v1270_v23 = vsel %vm601_vm7, 1.0, %v985_v21  ;;  %933 = vpow2.f32 %v612_v15  ;;  %v593_v35 = vsel %vm1253_vm6, %v1112_v37, %v1099_v32  ;;  %v594_v41 = vsel %vm1253_vm6, %v1116_v39, %v1105_v34  ;;  %v838_v15 = vld [vmem:[%s1096_s7 + $0x38] sm:$0xff] }
  0x59   : > { %v664_v25 = vadd.f32 %v1270_v23, %v1268_v1  ;;  %v610_v33 = vmul.f32 1.442695, %v609_v29  ;;  %v618_v40 = vmul.f32 1.442695, %v617_v30  ;;  %935 = vpow2.f32 %v620_v58  ;;  %v924_v45 = vpop.eup %923 }
  0x5a   : > { %v526_v57 = vadd.f32 %v918_v28, %v916_v24  ;;  %v483_v60 = vmul.f32 %v482_v36, %v482_v36  ;;  %v485_v3 = vmul.f32 %v484_v38, %v484_v38  ;;  %v926_v48 = vpop.eup %925  ;;  %v604_v32 = vsub.f32 %v593_v35, %v1169_v7 }
  0x5b   : > { %698 = vadd.xlane.f32.xlu1 %v664_v25  ;;  %937 = vpow2.f32 %v610_v33  ;;  %v606_v37 = vsub.f32 %v594_v41, %v1172_v8  ;;  %v472_v39 = vsel %vm1233_vm4, %v840_v56, %v836_v44  ;;  %v648_v61 = vadd.f32 %v924_v45, %v922_v43 }
  0x5c   : > { %939 = vpow2.f32 %v618_v40  ;;  %v530_v62 = vadd.f32 %v920_v31, %v526_v57  ;;  %v503_v53 = vsub.f32 %v1243_v50, %v834_v59  ;;  %v504_v55 = vmul.f32 0.5, %v1268_v1 }
  0x5d   : > { %v928_v34 = vpop.eup %927  ;;  %v486_v8 = vadd.f32 %v485_v3, %v483_v60  ;;  %v652_v63 = vadd.f32 %v926_v48, %v648_v61  ;;  %v605_v42 = vmul.f32 %v604_v32, %v604_v32  ;;  %v607_v14 = vmul.f32 %v606_v37, %v606_v37 }
  0x5e   : > { %941 = vlog2.f32 %v530_v62  ;;  %vm534_vm8 = vcmp.gt.f32.partialorder %v475_v49, %v472_v39  ;;  %v598_v18 = vsel %vm1253_vm6, %v840_v56, %v836_v44  ;;  %v599_v50 = vsel %vm1253_vm6, %v841_v46, %v837_v51 }
  0x5f   : > { %943 = vlog2.f32 %v652_v63  ;;  %v506_v2 = vmul.f32 %v503_v53, %v503_v53  ;;  %v508_v27 = vmul.f32 5.0, %v1268_v1  ;;  %v478_v28 = vsel %vm1233_vm4, %v842_v17, %v838_v15 }
  0x60   : > { %v930_v52 = vpop.eup %929  ;;  %v535_v29 = vsel %vm534_vm8, %v475_v49, %v472_v39  ;;  %v625_v31 = vsub.f32 %v1260_v16, %v851_v0  ;;  %vm656_vm9 = vcmp.gt.f32.partialorder %v599_v50, %v598_v18  ;;  %v608_v33 = vadd.f32 %v607_v14, %v605_v42 }
  0x61   : > { %v932_v7 = vpop.eup %931  ;;  %v492_v5 = vsub.f32 %v930_v52, %v914_v20  ;;  %v505_v20 = vadd.f32 0.5, %v504_v55  ;;  %v626_v43 = vmul.f32 0.5, %v1270_v23  ;;  %v536_v44 = vsel %vm534_vm8, %v1188_v54, %v1185_v4 }
  0x62   : > { %v500_v6 = vsub.f32 %v932_v7, %v928_v34  ;;  %v934_v21 = vpop.eup %933  ;;  %vm1325_vm10 = vcmp.gt.f32.partialorder %v478_v28, %v535_v29  ;;  %v600_v16 = vsel %vm1253_vm6, %v842_v17, %v838_v15  ;;  %v657_v56 = vsel %vm656_vm9, %v599_v50, %v598_v18 }
  0x63   : > { %v493_v58 = vmul.f32 %v492_v5, %v492_v5  ;;  %v936_v25 = vpop.eup %935  ;;  %v507_v35 = vmul.f32 %v506_v2, %v505_v20  ;;  %v630_v59 = vmul.f32 5.0, %v1270_v23  ;;  %v627_v3 = vadd.f32 0.5, %v626_v43 }
  0x64   : > { %v501_v24 = vmul.f32 %v500_v6, %v500_v6  ;;  %v628_v48 = vmul.f32 %v625_v31, %v625_v31  ;;  %v538_v4 = vsel %vm1325_vm10, %v1192_v9, %v536_v44  ;;  %v658_v54 = vsel %vm656_vm9, %v1200_v13, %v1197_v11 }
  0x65   : > { %v494_v26 = vadd.f32 %v493_v58, %v486_v8  ;;  %v938_v30 = vpop.eup %937  ;;  %vm659_vm11 = vcmp.gt.f32.partialorder %v600_v16, %v657_v56 }
  0x66   : > { %v940_v36 = vpop.eup %939  ;;  %v614_v40 = vsub.f32 %v938_v30, %v934_v21  ;;  %v629_v49 = vmul.f32 %v628_v48, %v627_v3  ;;  %v660_v53 = vsel %vm659_vm11, %v1210_v19, %v658_v54 }
  0x67   : > { %v502_v38 = vadd.f32 %v501_v24, %v494_v26  ;;  %v622_v41 = vsub.f32 %v940_v36, %v936_v25 }
  0x68   : > { %v615_v51 = vmul.f32 %v614_v40, %v614_v40  ;;  %v942_v46 = vpop.eup %941 }
  0x69   : > { %v509_v45 = vmul.f32 %v508_v27, %v502_v38  ;;  %v623_v57 = vmul.f32 %v622_v41, %v622_v41  ;;  %v532_v32 = vmul.f32 0.6931472, %v942_v46  ;;  %v944_v10 = vpop.eup %943  ;;  %v707_v27 = vlaneseq }
  0x6a   : > { %v616_v60 = vadd.f32 %v615_v51, %v608_v33  ;;  %v654_v39 = vmul.f32 0.6931472, %v944_v10 }
  0x6b   : > { %v511_v37 = vadd.f32 %v509_v45, %v507_v35  ;;  %v533_v34 = vadd.f32 %v532_v32, %v1204_v12  ;;  %v708_v28 = vshrl.u32 %v707_v27, 7  ;;  %v710_v29 = vand.u32 127, %v707_v27 }
  0x6c   : > { %v624_v62 = vadd.f32 %v623_v57, %v616_v60  ;;  %v655_v55 = vadd.f32 %v654_v39, %v1216_v22 }
  0x6d   : > { %v539_v52 = vsub.f32 %v533_v34, %v538_v4  ;;  %vm711_vm12 = vcmp.eq.s32.totalorder %v708_v28, 0  ;;  %vm716_vm13 = vcmp.eq.s32.totalorder %v710_v29, 2  ;;  %vm714_vm14 = vcmp.eq.s32.totalorder %v710_v29, 1 }
  0x6e   : > { %v631_v61 = vmul.f32 %v630_v59, %v624_v62  ;;  %v661_v8 = vsub.f32 %v655_v55, %v660_v53  ;;  %vm712_vm15 = vcmp.eq.s32.totalorder %v710_v29, 0  ;;  %vm717_vm0 = vmand %vm711_vm12, %vm716_vm13 }
  0x6f   : > { %v540_v9 = vmul.f32 %v1268_v1, %v539_v52  ;;  %vm715_vm1 = vmand %vm711_vm12, %vm714_vm14 }
  0x70   : > { %v632_v7 = vadd.f32 %v631_v61, %v511_v37  ;;  %v662_v11 = vmul.f32 %v1270_v23, %v661_v8  ;;  %vm713_vm2 = vmand %vm711_vm12, %vm712_vm15 }
  0x72   : > { %v633_v5 = vadd.f32 %v632_v7, %v629_v49  ;;  %v663_v13 = vadd.f32 %v662_v11, %v540_v9 }
  0x74   : > { %678 = vadd.xlane.f32.xlu0 %v633_v5 }
  0x78   : > { %688 = vadd.xlane.f32.xlu0 %v663_v13 }
  0xe8   : > { %v699_v63 = vpop.xlane.xlu1 %698 }
  0xe9   : > { %v700_v12 = vrot.slane %v699_v63, 4 }
  0xeb   : > { %v701_v6 = vadd.f32 %v700_v12, %v699_v63 }
  0xed   : > { %v702_v17 = vrot.slane %v701_v6, 2 }
  0xef   : > { %v703_v18 = vadd.f32 %v702_v17, %v701_v6 }
  0xf1   : > { %v704_v24 = vrot.slane %v703_v18, 1 }
  0xf3   : > { %v705_v26 = vadd.f32 %v704_v24, %v703_v18 }
 0x101   : > { %v679_v42 = vpop.xlane.xlu0 %678 }
 0x102   : > { %v680_v14 = vrot.slane %v679_v42, 4 }
 0x104   : > { %v681_v15 = vadd.f32 %v680_v14, %v679_v42 }
 0x105   : > { %v689_v19 = vpop.xlane.xlu0 %688 }
 0x106   : > { %v682_v58 = vrot.slane %v681_v15, 2  ;;  %v690_v22 = vrot.slane %v689_v19, 4 }
 0x108   : > { %v691_v0 = vadd.f32 %v690_v22, %v689_v19  ;;  %v683_v1 = vadd.f32 %v682_v58, %v681_v15 }
 0x10a   : > { %v692_v50 = vrot.slane %v691_v0, 2  ;;  %v684_v23 = vrot.slane %v683_v1, 1 }
 0x10c   : > { %v693_v21 = vadd.f32 %v692_v50, %v691_v0  ;;  %v685_v2 = vadd.f32 %v684_v23, %v683_v1 }
 0x10e   : > { %858 = vpush %v685_v2  ;;  %v694_v20 = vrot.slane %v693_v21, 1 }
 0x110   : > { %v695_v25 = vadd.f32 %v694_v20, %v693_v21 }
 0x112   : > { %860 = vpush %v695_v25 }
 0x113   : > { %862 = vpush %v705_v26 }
 0x13f   : > { %s859_s9 = spop %858 }
 0x140   : > { %v722_v38 = vstv %s859_s9 }
 0x143   : > { %s861_s15 = spop %860 }
 0x144   : > { %v720_v30 = vstv %s861_s15  ;;  %s863_s17 = spop %862 }
 0x145   : > { %v718_v31 = vstv %s863_s17 }
 0x146   : > { %v719_v36 = vsel %vm717_vm0, %v718_v31, 0.0 }
 0x147   : > { %v721_v33 = vsel %vm715_vm1, %v720_v30, %v719_v36 }
 0x148   : > { %v723_v40 = vsel %vm713_vm2, %v722_v38, %v721_v33 }
 0x149   : > { %724 = vst [vmem:[%s369_s21] sm:$0xff] %v723_v40 }
 0x14a PF: > { %s12_s13 = sadd.s32 1, %s983_s13   ;;  %s1374_s9 = smov %s971_s10 }
 0x14b   : > { %p9_p10 = scmp.ge.s32.totalorder %s12_s13, 4   ;;  %s1375_s10 = smov %s1040_s18 }
 0x14c   : > { %s1376_s11 = smov %s979_s12  ;;  %s1377_s12 = smov %s1379_s14 }
 0x14d   :  { %11 = sbr.rel (!%p9_p10) target bundleno = 3 (0x3), region = 185 }

</bundles_post_ra>
